<compile_context>
chip_gen: v5e
topology: v5e:2x2
jax: 0.10.0
libtpu: 0.0.40
codegen_flags: <defaults>
</compile_context>

<pallas_src>
import jax
import jax.numpy as jnp
from jax.experimental import pallas as pl
from jax.experimental.pallas import tpu as pltpu

_EPS = 1e-5


def _make_dc_loading_kernel(B, d, N, h0, h1):
    """Builds the fused kernel body, closed over the static problem sizes."""
    BN = B * N

    def kernel(a1t_ref, a2t_ref, x_ref, w1_ref, w2_ref,
               g1_ref, b1_ref, g2_ref, b2_ref, out_ref, xf_ref):
        A1t = a1t_ref[...]          # (N, N) == A1^T (pre-transposed host-side)
        A2t = a2t_ref[...]          # (N, N) == A2^T

        def dmm(lhs, rhs):
            # NN-form contraction (lhs dim 1 with rhs dim 0); f32 accumulation.
            # For bf16 supports only the MXU operands are narrowed.
            return jnp.dot(lhs.astype(rhs.dtype), rhs,
                           preferred_element_type=jnp.float32)

        def diffusion_to_scratch(X0, c_in):
            """X0: (B*c_in, N), rows b*c_in + c.  Fills Xf scratch, returns view."""
            # Two separate first-order dots (no Acat, no lane-slice split).
            X1a = dmm(X0, A1t)                       # X0 @ A1^T
            X1b = dmm(X0, A2t)                       # X0 @ A2^T
            X2a = 2.0 * dmm(X1a, A1t) - X0           # Chebyshev 2nd order
            X2b = 2.0 * dmm(X1b, A2t) - X0
            # Direct block stores into the shared VMEM scratch at fixed offsets
            # (no jnp.stack copy): Xf[k*c_in + c, b*N + n] = Xk[b*c_in + c, n].
            for k, Xk in enumerate((X0, X1a, X2a, X1b, X2b)):
                for b in range(B):
                    xf_ref[k * c_in:(k + 1) * c_in, b * N:(b + 1) * N] = (
                        Xk[b * c_in:(b + 1) * c_in, :])
            return xf_ref[0:5 * c_in, :]             # (5*c_in, B*N)

        def project_bn_relu(Xf, Wr, gamma, beta):
            # ONE lane-dense projection matmul per layer: (c_out,5c_in)@(5c_in,B*N).
            H = jnp.dot(Wr, Xf, preferred_element_type=jnp.float32)
            # Training-mode BatchNorm1d per channel row over all (batch, node)
            # columns: centered two-pass biased variance (numerically safe).
            inv_cnt = 1.0 / float(BN)
            mean = jnp.sum(H, axis=1, keepdims=True) * inv_cnt
            Hc = H - mean
            var = jnp.sum(Hc * Hc, axis=1, keepdims=True) * inv_cnt
            scale = gamma * jax.lax.rsqrt(var + _EPS)
            # dp == 0 -> Dropout identity; act == relu.
            return jnp.maximum(Hc * scale + beta, 0.0)

        # ---- layer 1: dc1 -> (fused transpose) -> bn1 -> dropout(id) -> relu ----
        Xf1 = diffusion_to_scratch(x_ref[...], d)
        H1 = project_bn_relu(Xf1, w1_ref[...], g1_ref[...], b1_ref[...])   # (h0, B*N)

        # ---- layer 2 ----
        # Back to diffusion row layout (B*h0, N): per-batch lane slices stacked
        # along sublanes (static slices + axis-0 concat only; no value reshape).
        X0_2 = jnp.concatenate([H1[:, b * N:(b + 1) * N] for b in range(B)], axis=0)
        Xf2 = diffusion_to_scratch(X0_2, h0)
        H2 = project_bn_relu(Xf2, w2_ref[...], g2_ref[...], b2_ref[...])   # (h1, B*N)

        # ---- mean over nodes -> (h1, B); wrapper transposes to (B, h1) ----
        cols = [jnp.mean(H2[:, b * N:(b + 1) * N], axis=1, keepdims=True)
                for b in range(B)]
        out_ref[...] = jnp.concatenate(cols, axis=1)

    return kernel


def _vmem_capacity_bytes():
    """Generation-aware VMEM capacity (falls back to the smallest, v7x)."""
    try:
        info = pltpu.get_tpu_info()
        cap = int(getattr(info, "vmem_capacity_bytes", 0))
        if cap > 0:
            return cap
    except Exception:
        pass
    return 64 << 20


def dc_loading_forward(A1, A2, X, W1, W2, g1, b1, g2, b2,
                       *, support_dtype=jnp.float32):
    """X: (B, d, N) channels-first.  Returns (B, h1).

    For v6e/v7x production, pass support_dtype=jnp.bfloat16 (halves the (N,N)
    supports' HBM/VMEM cost; f32 accumulation retained) after validating the
    accumulated rounding across the two Chebyshev layers is acceptable.
    """
    B, d, N = X.shape
    h0 = W1.shape[1]
    h1 = W2.shape[1]

    # ---- host-side layout plumbing only (one-time, outside the kernel) ----
    # Pre-transpose the dense supports so every in-kernel diffusion matmul is a
    # plain NN-form contraction (no in-kernel transpose of the (N,N) operand).
    A1t = jnp.asarray(A1).T.astype(support_dtype)
    A2t = jnp.asarray(A2).T.astype(support_dtype)
    # Activations keep the PyTorch row order b*c_in + c.
    X2d = X.reshape(B * d, N).astype(jnp.float32)
    # W rows r = c*5 + k  ->  Wr[o, k*c_in + c] so each layer's projection is a
    # single (c_out, 5*c_in) @ (5*c_in, B*N) matmul in the kernel's layout.
    W1r = W1.reshape(d, 5, h0).transpose(2, 1, 0).reshape(h0, 5 * d).astype(jnp.float32)
    W2r = W2.reshape(h0, 5, h1).transpose(2, 1, 0).reshape(h1, 5 * h0).astype(jnp.float32)
    g1r = g1.reshape(h0, 1).astype(jnp.float32)
    b1r = b1.reshape(h0, 1).astype(jnp.float32)
    g2r = g2.reshape(h1, 1).astype(jnp.float32)
    b2r = b2.reshape(h1, 1).astype(jnp.float32)

    # ---- generation-aware scoped-VMEM limit (v5e default is only 16 MiB) ----
    f32b = 4
    a_bytes = 2 * N * N * jnp.dtype(support_dtype).itemsize
    scratch_bytes = 5 * max(d, h0) * B * N * f32b
    act_bytes = 12 * max(d, h0, h1) * B * N * f32b      # diffusion terms + H + temps
    w_bytes = (W1r.size + W2r.size) * f32b
    need = a_bytes + scratch_bytes + act_bytes + w_bytes + X2d.size * f32b + (2 << 20)
    cap = _vmem_capacity_bytes()
    vmem_limit = int(min(cap - (8 << 20), max(32 << 20, 2 * need)))

    vmem = pl.BlockSpec(memory_space=pltpu.MemorySpace.VMEM)
    kernel = _make_dc_loading_kernel(B, d, N, h0, h1)
    out = pl.pallas_call(
        kernel,
        out_shape=jax.ShapeDtypeStruct((h1, B), jnp.float32),
        in_specs=[vmem] * 9,
        out_specs=vmem,
        scratch_shapes=[pltpu.VMEM((5 * max(d, h0), B * N), jnp.float32)],
        compiler_params=pltpu.CompilerParams(vmem_limit_bytes=vmem_limit),
    )(A1t, A2t, X2d, W1r, W2r, g1r, b1r, g2r, b2r)
    return out.T                                          # (B, h1)


# ----------------------- pure-JAX reference (PyTorch semantics) ----------------------
def reference(A_list, X, W1, W2, g1, b1, g2, b2):
    def dgc(X, W):
        B, d, n = X.shape
        X0 = X.reshape(-1, n)
        Xc = [X0]
        for A in A_list:
            X1 = (A @ X0.T).T
            Xc.append(X1)
            X2 = 2.0 * (A @ X1.T).T - X0
            Xc.append(X2)
        Xs = jnp.stack(Xc, axis=2)                                   # (B*d, n, 5)
        Xs = Xs.reshape(B, d, n, 5).transpose(0, 2, 1, 3).reshape(B, n, d * 5)
        return Xs @ W                                                # (B, n, out)

    def bn_relu(H, g, b):
        mean = H.mean(axis=(0, 2), keepdims=True)
        var = ((H - mean) ** 2).mean(axis=(0, 2), keepdims=True)
        Hn = (H - mean) / jnp.sqrt(var + _EPS)
        return jnp.maximum(Hn * g.reshape(1, -1, 1) + b.reshape(1, -1, 1), 0.0)

    H1 = bn_relu(dgc(X, W1).transpose(0, 2, 1), g1, b1)
    H2 = bn_relu(dgc(H1, W2).transpose(0, 2, 1), g2, b2)
    return H2.mean(axis=2)


if __name__ == "__main__":
    B, d, N = 2, 4, 128          # batch, in_features, num nodes
    h0, h1 = 32, 32              # hidden_features

    key = jax.random.PRNGKey(0)
    k1, k2, k3, k4, k5 = jax.random.split(key, 5)

    # Dense random-walk style supports (stand-in for the sparse A list, len == 2).
    A1 = jax.random.uniform(k1, (N, N), jnp.float32)
    A1 = A1 / A1.sum(axis=1, keepdims=True)
    A2 = jax.random.uniform(k2, (N, N), jnp.float32)
    A2 = A2 / A2.sum(axis=1, keepdims=True)

    X = jax.random.normal(k3, (B, d, N), jnp.float32)

    # Deterministic parameter init matching the module's __init__.
    stdv1 = 1.0 / (h0 ** 0.5)
    stdv2 = 1.0 / (h1 ** 0.5)
    W1 = jax.random.uniform(k4, (5 * d, h0), jnp.float32, -stdv1, stdv1)
    W2 = jax.random.uniform(k5, (5 * h0, h1), jnp.float32, -stdv2, stdv2)
    g1 = jnp.ones((h0,), jnp.float32); b1 = jnp.zeros((h0,), jnp.float32)
    g2 = jnp.ones((h1,), jnp.float32); b2 = jnp.zeros((h1,), jnp.float32)

    out = dc_loading_forward(A1, A2, X, W1, W2, g1, b1, g2, b2)
    out = jax.block_until_ready(out)

    ref = reference([A1, A2], X, W1, W2, g1, b1, g2, b2)
    assert out.shape == (B, h1), out.shape
    assert jnp.allclose(out, ref, rtol=1e-3, atol=1e-3), \
        float(jnp.max(jnp.abs(out - ref)))
    print("KERNEL_OK")
</pallas_src>

<mosaic_0001>
module attributes {stable_mosaic.version = 11 : i64} {
  func.func @kernel(%arg0: memref<128x128xf32, #tpu.memory_space<vmem>>, %arg1: memref<128x128xf32, #tpu.memory_space<vmem>>, %arg2: memref<8x128xf32, #tpu.memory_space<vmem>>, %arg3: memref<32x20xf32, #tpu.memory_space<vmem>>, %arg4: memref<32x160xf32, #tpu.memory_space<vmem>>, %arg5: memref<32x1xf32, #tpu.memory_space<vmem>>, %arg6: memref<32x1xf32, #tpu.memory_space<vmem>>, %arg7: memref<32x1xf32, #tpu.memory_space<vmem>>, %arg8: memref<32x1xf32, #tpu.memory_space<vmem>>, %arg9: memref<32x2xf32, #tpu.memory_space<vmem>>, %arg10: memref<160x256xf32, #tpu.memory_space<vmem>>) attributes {dimension_semantics = [], scalar_prefetch = 0 : i64, scratch_operands = 1 : i64, tpu.core_type = #tpu.core_type<tc>} {
    %c0 = arith.constant 0 : index
    %c0_0 = arith.constant 0 : index
    %0 = vector.load %arg0[%c0, %c0_0] : memref<128x128xf32, #tpu.memory_space<vmem>>, vector<128x128xf32>
    %c0_1 = arith.constant 0 : index
    %c0_2 = arith.constant 0 : index
    %1 = vector.load %arg1[%c0_1, %c0_2] : memref<128x128xf32, #tpu.memory_space<vmem>>, vector<128x128xf32>
    %c0_3 = arith.constant 0 : index
    %c0_4 = arith.constant 0 : index
    %2 = vector.load %arg2[%c0_3, %c0_4] : memref<8x128xf32, #tpu.memory_space<vmem>>, vector<8x128xf32>
    %cst = arith.constant dense<0.000000e+00> : vector<8x128xf32>
    %3 = tpu.matmul %2, %0, %cst {dimension_numbers = #tpu.dot_dimension_numbers<[1], [0], [0], [1], [0, 0, 1, 1], [], []>} : vector<8x128xf32>, vector<128x128xf32>, vector<8x128xf32> -> vector<8x128xf32>
    %cst_5 = arith.constant dense<0.000000e+00> : vector<8x128xf32>
    %4 = tpu.matmul %2, %1, %cst_5 {dimension_numbers = #tpu.dot_dimension_numbers<[1], [0], [0], [1], [0, 0, 1, 1], [], []>} : vector<8x128xf32>, vector<128x128xf32>, vector<8x128xf32> -> vector<8x128xf32>
    %cst_6 = arith.constant dense<0.000000e+00> : vector<8x128xf32>
    %5 = tpu.matmul %3, %0, %cst_6 {dimension_numbers = #tpu.dot_dimension_numbers<[1], [0], [0], [1], [0, 0, 1, 1], [], []>} : vector<8x128xf32>, vector<128x128xf32>, vector<8x128xf32> -> vector<8x128xf32>
    %cst_7 = arith.constant 2.000000e+00 : f32
    %6 = vector.broadcast %cst_7 : f32 to vector<8x128xf32>
    %7 = arith.mulf %6, %5 : vector<8x128xf32>
    %8 = arith.subf %7, %2 : vector<8x128xf32>
    %cst_8 = arith.constant dense<0.000000e+00> : vector<8x128xf32>
    %9 = tpu.matmul %4, %1, %cst_8 {dimension_numbers = #tpu.dot_dimension_numbers<[1], [0], [0], [1], [0, 0, 1, 1], [], []>} : vector<8x128xf32>, vector<128x128xf32>, vector<8x128xf32> -> vector<8x128xf32>
    %cst_9 = arith.constant 2.000000e+00 : f32
    %10 = vector.broadcast %cst_9 : f32 to vector<8x128xf32>
    %11 = arith.mulf %10, %9 : vector<8x128xf32>
    %12 = arith.subf %11, %2 : vector<8x128xf32>
    %13 = vector.extract_strided_slice %2 {offsets = [0, 0], sizes = [4, 128], strides = [1, 1]} : vector<8x128xf32> to vector<4x128xf32>
    %c0_10 = arith.constant 0 : index
    %c0_11 = arith.constant 0 : index
    %14 = vector.load %arg10[%c0_10, %c0_11] : memref<160x256xf32, #tpu.memory_space<vmem>>, vector<4x128xf32>
    tpu.vector_store %arg10[%c0_10, %c0_11], %13 {strides = array<i32>} : memref<160x256xf32, #tpu.memory_space<vmem>>, vector<4x128xf32>,
    %15 = vector.extract_strided_slice %2 {offsets = [4, 0], sizes = [4, 128], strides = [1, 1]} : vector<8x128xf32> to vector<4x128xf32>
    %c0_12 = arith.constant 0 : index
    %c128 = arith.constant 128 : index
    %16 = vector.load %arg10[%c0_12, %c128] : memref<160x256xf32, #tpu.memory_space<vmem>>, vector<4x128xf32>
    tpu.vector_store %arg10[%c0_12, %c128], %15 {strides = array<i32>} : memref<160x256xf32, #tpu.memory_space<vmem>>, vector<4x128xf32>,
    %17 = vector.extract_strided_slice %3 {offsets = [0, 0], sizes = [4, 128], strides = [1, 1]} : vector<8x128xf32> to vector<4x128xf32>
    %c4 = arith.constant 4 : index
    %c0_13 = arith.constant 0 : index
    %18 = vector.load %arg10[%c4, %c0_13] : memref<160x256xf32, #tpu.memory_space<vmem>>, vector<4x128xf32>
    tpu.vector_store %arg10[%c4, %c0_13], %17 {strides = array<i32>} : memref<160x256xf32, #tpu.memory_space<vmem>>, vector<4x128xf32>,
    %19 = vector.extract_strided_slice %3 {offsets = [4, 0], sizes = [4, 128], strides = [1, 1]} : vector<8x128xf32> to vector<4x128xf32>
    %c4_14 = arith.constant 4 : index
    %c128_15 = arith.constant 128 : index
    %20 = vector.load %arg10[%c4_14, %c128_15] : memref<160x256xf32, #tpu.memory_space<vmem>>, vector<4x128xf32>
    tpu.vector_store %arg10[%c4_14, %c128_15], %19 {strides = array<i32>} : memref<160x256xf32, #tpu.memory_space<vmem>>, vector<4x128xf32>,
    %21 = vector.extract_strided_slice %8 {offsets = [0, 0], sizes = [4, 128], strides = [1, 1]} : vector<8x128xf32> to vector<4x128xf32>
    %c8 = arith.constant 8 : index
    %c0_16 = arith.constant 0 : index
    %22 = vector.load %arg10[%c8, %c0_16] : memref<160x256xf32, #tpu.memory_space<vmem>>, vector<4x128xf32>
    tpu.vector_store %arg10[%c8, %c0_16], %21 {strides = array<i32>} : memref<160x256xf32, #tpu.memory_space<vmem>>, vector<4x128xf32>,
    %23 = vector.extract_strided_slice %8 {offsets = [4, 0], sizes = [4, 128], strides = [1, 1]} : vector<8x128xf32> to vector<4x128xf32>
    %c8_17 = arith.constant 8 : index
    %c128_18 = arith.constant 128 : index
    %24 = vector.load %arg10[%c8_17, %c128_18] : memref<160x256xf32, #tpu.memory_space<vmem>>, vector<4x128xf32>
    tpu.vector_store %arg10[%c8_17, %c128_18], %23 {strides = array<i32>} : memref<160x256xf32, #tpu.memory_space<vmem>>, vector<4x128xf32>,
    %25 = vector.extract_strided_slice %4 {offsets = [0, 0], sizes = [4, 128], strides = [1, 1]} : vector<8x128xf32> to vector<4x128xf32>
    %c12 = arith.constant 12 : index
    %c0_19 = arith.constant 0 : index
    %26 = vector.load %arg10[%c12, %c0_19] : memref<160x256xf32, #tpu.memory_space<vmem>>, vector<4x128xf32>
    tpu.vector_store %arg10[%c12, %c0_19], %25 {strides = array<i32>} : memref<160x256xf32, #tpu.memory_space<vmem>>, vector<4x128xf32>,
    %27 = vector.extract_strided_slice %4 {offsets = [4, 0], sizes = [4, 128], strides = [1, 1]} : vector<8x128xf32> to vector<4x128xf32>
    %c12_20 = arith.constant 12 : index
    %c128_21 = arith.constant 128 : index
    %28 = vector.load %arg10[%c12_20, %c128_21] : memref<160x256xf32, #tpu.memory_space<vmem>>, vector<4x128xf32>
    tpu.vector_store %arg10[%c12_20, %c128_21], %27 {strides = array<i32>} : memref<160x256xf32, #tpu.memory_space<vmem>>, vector<4x128xf32>,
    %29 = vector.extract_strided_slice %12 {offsets = [0, 0], sizes = [4, 128], strides = [1, 1]} : vector<8x128xf32> to vector<4x128xf32>
    %c16 = arith.constant 16 : index
    %c0_22 = arith.constant 0 : index
    %30 = vector.load %arg10[%c16, %c0_22] : memref<160x256xf32, #tpu.memory_space<vmem>>, vector<4x128xf32>
    tpu.vector_store %arg10[%c16, %c0_22], %29 {strides = array<i32>} : memref<160x256xf32, #tpu.memory_space<vmem>>, vector<4x128xf32>,
    %31 = vector.extract_strided_slice %12 {offsets = [4, 0], sizes = [4, 128], strides = [1, 1]} : vector<8x128xf32> to vector<4x128xf32>
    %c16_23 = arith.constant 16 : index
    %c128_24 = arith.constant 128 : index
    %32 = vector.load %arg10[%c16_23, %c128_24] : memref<160x256xf32, #tpu.memory_space<vmem>>, vector<4x128xf32>
    tpu.vector_store %arg10[%c16_23, %c128_24], %31 {strides = array<i32>} : memref<160x256xf32, #tpu.memory_space<vmem>>, vector<4x128xf32>,
    %c0_25 = arith.constant 0 : index
    %c0_26 = arith.constant 0 : index
    %33 = vector.load %arg10[%c0_25, %c0_26] : memref<160x256xf32, #tpu.memory_space<vmem>>, vector<20x256xf32>
    %c0_27 = arith.constant 0 : index
    %c0_28 = arith.constant 0 : index
    %34 = vector.load %arg3[%c0_27, %c0_28] : memref<32x20xf32, #tpu.memory_space<vmem>>, vector<32x20xf32>
    %c0_29 = arith.constant 0 : index
    %c0_30 = arith.constant 0 : index
    %35 = vector.load %arg5[%c0_29, %c0_30] : memref<32x1xf32, #tpu.memory_space<vmem>>, vector<32x1xf32>
    %c0_31 = arith.constant 0 : index
    %c0_32 = arith.constant 0 : index
    %36 = vector.load %arg6[%c0_31, %c0_32] : memref<32x1xf32, #tpu.memory_space<vmem>>, vector<32x1xf32>
    %cst_33 = arith.constant dense<0.000000e+00> : vector<32x256xf32>
    %37 = tpu.matmul %34, %33, %cst_33 {dimension_numbers = #tpu.dot_dimension_numbers<[1], [0], [0], [1], [0, 0, 1, 1], [], []>} : vector<32x20xf32>, vector<20x256xf32>, vector<32x256xf32> -> vector<32x256xf32>
    %cst_34 = arith.constant dense<0.000000e+00> : vector<32xf32>
    %38 = vector.multi_reduction <add>, %37, %cst_34 [1] : vector<32x256xf32> to vector<32xf32>
    %39 = vector.shape_cast %38 : vector<32xf32> to vector<32x1xf32>
    %cst_35 = arith.constant 3.906250e-03 : f32
    %40 = vector.broadcast %cst_35 : f32 to vector<32x1xf32>
    %41 = arith.mulf %39, %40 : vector<32x1xf32>
    %42 = vector.broadcast %41 : vector<32x1xf32> to vector<32x256xf32>
    %43 = arith.subf %37, %42 : vector<32x256xf32>
    %44 = arith.mulf %43, %43 : vector<32x256xf32>
    %cst_36 = arith.constant dense<0.000000e+00> : vector<32xf32>
    %45 = vector.multi_reduction <add>, %44, %cst_36 [1] : vector<32x256xf32> to vector<32xf32>
    %46 = vector.shape_cast %45 : vector<32xf32> to vector<32x1xf32>
    %cst_37 = arith.constant 3.906250e-03 : f32
    %47 = vector.broadcast %cst_37 : f32 to vector<32x1xf32>
    %48 = arith.mulf %46, %47 : vector<32x1xf32>
    %cst_38 = arith.constant 9.99999974E-6 : f32
    %49 = vector.broadcast %cst_38 : f32 to vector<32x1xf32>
    %50 = arith.addf %48, %49 : vector<32x1xf32>
    %51 = math.rsqrt %50 : vector<32x1xf32>
    %52 = arith.mulf %35, %51 : vector<32x1xf32>
    %53 = vector.broadcast %52 : vector<32x1xf32> to vector<32x256xf32>
    %54 = arith.mulf %43, %53 : vector<32x256xf32>
    %55 = vector.broadcast %36 : vector<32x1xf32> to vector<32x256xf32>
    %56 = arith.addf %54, %55 : vector<32x256xf32>
    %cst_39 = arith.constant 0.000000e+00 : f32
    %57 = vector.broadcast %cst_39 : f32 to vector<32x256xf32>
    %58 = arith.maximumf %56, %57 : vector<32x256xf32>
    %59 = vector.extract_strided_slice %58 {offsets = [0, 0], sizes = [32, 128], strides = [1, 1]} : vector<32x256xf32> to vector<32x128xf32>
    %60 = vector.extract_strided_slice %58 {offsets = [0, 128], sizes = [32, 128], strides = [1, 1]} : vector<32x256xf32> to vector<32x128xf32>
    %61 = tpu.concatenate %59, %60 in 0 : vector<32x128xf32>, vector<32x128xf32> -> vector<64x128xf32>
    %cst_40 = arith.constant dense<0.000000e+00> : vector<64x128xf32>
    %62 = tpu.matmul %61, %0, %cst_40 {dimension_numbers = #tpu.dot_dimension_numbers<[1], [0], [0], [1], [0, 0, 1, 1], [], []>} : vector<64x128xf32>, vector<128x128xf32>, vector<64x128xf32> -> vector<64x128xf32>
    %cst_41 = arith.constant dense<0.000000e+00> : vector<64x128xf32>
    %63 = tpu.matmul %61, %1, %cst_41 {dimension_numbers = #tpu.dot_dimension_numbers<[1], [0], [0], [1], [0, 0, 1, 1], [], []>} : vector<64x128xf32>, vector<128x128xf32>, vector<64x128xf32> -> vector<64x128xf32>
    %cst_42 = arith.constant dense<0.000000e+00> : vector<64x128xf32>
    %64 = tpu.matmul %62, %0, %cst_42 {dimension_numbers = #tpu.dot_dimension_numbers<[1], [0], [0], [1], [0, 0, 1, 1], [], []>} : vector<64x128xf32>, vector<128x128xf32>, vector<64x128xf32> -> vector<64x128xf32>
    %cst_43 = arith.constant 2.000000e+00 : f32
    %65 = vector.broadcast %cst_43 : f32 to vector<64x128xf32>
    %66 = arith.mulf %65, %64 : vector<64x128xf32>
    %67 = arith.subf %66, %61 : vector<64x128xf32>
    %cst_44 = arith.constant dense<0.000000e+00> : vector<64x128xf32>
    %68 = tpu.matmul %63, %1, %cst_44 {dimension_numbers = #tpu.dot_dimension_numbers<[1], [0], [0], [1], [0, 0, 1, 1], [], []>} : vector<64x128xf32>, vector<128x128xf32>, vector<64x128xf32> -> vector<64x128xf32>
    %cst_45 = arith.constant 2.000000e+00 : f32
    %69 = vector.broadcast %cst_45 : f32 to vector<64x128xf32>
    %70 = arith.mulf %69, %68 : vector<64x128xf32>
    %71 = arith.subf %70, %61 : vector<64x128xf32>
    %72 = vector.extract_strided_slice %61 {offsets = [0, 0], sizes = [32, 128], strides = [1, 1]} : vector<64x128xf32> to vector<32x128xf32>
    %c0_46 = arith.constant 0 : index
    %c0_47 = arith.constant 0 : index
    %73 = vector.load %arg10[%c0_46, %c0_47] : memref<160x256xf32, #tpu.memory_space<vmem>>, vector<32x128xf32>
    tpu.vector_store %arg10[%c0_46, %c0_47], %72 {strides = array<i32>} : memref<160x256xf32, #tpu.memory_space<vmem>>, vector<32x128xf32>,
    %74 = vector.extract_strided_slice %61 {offsets = [32, 0], sizes = [32, 128], strides = [1, 1]} : vector<64x128xf32> to vector<32x128xf32>
    %c0_48 = arith.constant 0 : index
    %c128_49 = arith.constant 128 : index
    %75 = vector.load %arg10[%c0_48, %c128_49] : memref<160x256xf32, #tpu.memory_space<vmem>>, vector<32x128xf32>
    tpu.vector_store %arg10[%c0_48, %c128_49], %74 {strides = array<i32>} : memref<160x256xf32, #tpu.memory_space<vmem>>, vector<32x128xf32>,
    %76 = vector.extract_strided_slice %62 {offsets = [0, 0], sizes = [32, 128], strides = [1, 1]} : vector<64x128xf32> to vector<32x128xf32>
    %c32 = arith.constant 32 : index
    %c0_50 = arith.constant 0 : index
    %77 = vector.load %arg10[%c32, %c0_50] : memref<160x256xf32, #tpu.memory_space<vmem>>, vector<32x128xf32>
    tpu.vector_store %arg10[%c32, %c0_50], %76 {strides = array<i32>} : memref<160x256xf32, #tpu.memory_space<vmem>>, vector<32x128xf32>,
    %78 = vector.extract_strided_slice %62 {offsets = [32, 0], sizes = [32, 128], strides = [1, 1]} : vector<64x128xf32> to vector<32x128xf32>
    %c32_51 = arith.constant 32 : index
    %c128_52 = arith.constant 128 : index
    %79 = vector.load %arg10[%c32_51, %c128_52] : memref<160x256xf32, #tpu.memory_space<vmem>>, vector<32x128xf32>
    tpu.vector_store %arg10[%c32_51, %c128_52], %78 {strides = array<i32>} : memref<160x256xf32, #tpu.memory_space<vmem>>, vector<32x128xf32>,
    %80 = vector.extract_strided_slice %67 {offsets = [0, 0], sizes = [32, 128], strides = [1, 1]} : vector<64x128xf32> to vector<32x128xf32>
    %c64 = arith.constant 64 : index
    %c0_53 = arith.constant 0 : index
    %81 = vector.load %arg10[%c64, %c0_53] : memref<160x256xf32, #tpu.memory_space<vmem>>, vector<32x128xf32>
    tpu.vector_store %arg10[%c64, %c0_53], %80 {strides = array<i32>} : memref<160x256xf32, #tpu.memory_space<vmem>>, vector<32x128xf32>,
    %82 = vector.extract_strided_slice %67 {offsets = [32, 0], sizes = [32, 128], strides = [1, 1]} : vector<64x128xf32> to vector<32x128xf32>
    %c64_54 = arith.constant 64 : index
    %c128_55 = arith.constant 128 : index
    %83 = vector.load %arg10[%c64_54, %c128_55] : memref<160x256xf32, #tpu.memory_space<vmem>>, vector<32x128xf32>
    tpu.vector_store %arg10[%c64_54, %c128_55], %82 {strides = array<i32>} : memref<160x256xf32, #tpu.memory_space<vmem>>, vector<32x128xf32>,
    %84 = vector.extract_strided_slice %63 {offsets = [0, 0], sizes = [32, 128], strides = [1, 1]} : vector<64x128xf32> to vector<32x128xf32>
    %c96 = arith.constant 96 : index
    %c0_56 = arith.constant 0 : index
    %85 = vector.load %arg10[%c96, %c0_56] : memref<160x256xf32, #tpu.memory_space<vmem>>, vector<32x128xf32>
    tpu.vector_store %arg10[%c96, %c0_56], %84 {strides = array<i32>} : memref<160x256xf32, #tpu.memory_space<vmem>>, vector<32x128xf32>,
    %86 = vector.extract_strided_slice %63 {offsets = [32, 0], sizes = [32, 128], strides = [1, 1]} : vector<64x128xf32> to vector<32x128xf32>
    %c96_57 = arith.constant 96 : index
    %c128_58 = arith.constant 128 : index
    %87 = vector.load %arg10[%c96_57, %c128_58] : memref<160x256xf32, #tpu.memory_space<vmem>>, vector<32x128xf32>
    tpu.vector_store %arg10[%c96_57, %c128_58], %86 {strides = array<i32>} : memref<160x256xf32, #tpu.memory_space<vmem>>, vector<32x128xf32>,
    %88 = vector.extract_strided_slice %71 {offsets = [0, 0], sizes = [32, 128], strides = [1, 1]} : vector<64x128xf32> to vector<32x128xf32>
    %c128_59 = arith.constant 128 : index
    %c0_60 = arith.constant 0 : index
    %89 = vector.load %arg10[%c128_59, %c0_60] : memref<160x256xf32, #tpu.memory_space<vmem>>, vector<32x128xf32>
    tpu.vector_store %arg10[%c128_59, %c0_60], %88 {strides = array<i32>} : memref<160x256xf32, #tpu.memory_space<vmem>>, vector<32x128xf32>,
    %90 = vector.extract_strided_slice %71 {offsets = [32, 0], sizes = [32, 128], strides = [1, 1]} : vector<64x128xf32> to vector<32x128xf32>
    %c128_61 = arith.constant 128 : index
    %c128_62 = arith.constant 128 : index
    %91 = vector.load %arg10[%c128_61, %c128_62] : memref<160x256xf32, #tpu.memory_space<vmem>>, vector<32x128xf32>
    tpu.vector_store %arg10[%c128_61, %c128_62], %90 {strides = array<i32>} : memref<160x256xf32, #tpu.memory_space<vmem>>, vector<32x128xf32>,
    %c0_63 = arith.constant 0 : index
    %c0_64 = arith.constant 0 : index
    %92 = vector.load %arg10[%c0_63, %c0_64] : memref<160x256xf32, #tpu.memory_space<vmem>>, vector<160x256xf32>
    %c0_65 = arith.constant 0 : index
    %c0_66 = arith.constant 0 : index
    %93 = vector.load %arg4[%c0_65, %c0_66] : memref<32x160xf32, #tpu.memory_space<vmem>>, vector<32x160xf32>
    %c0_67 = arith.constant 0 : index
    %c0_68 = arith.constant 0 : index
    %94 = vector.load %arg7[%c0_67, %c0_68] : memref<32x1xf32, #tpu.memory_space<vmem>>, vector<32x1xf32>
    %c0_69 = arith.constant 0 : index
    %c0_70 = arith.constant 0 : index
    %95 = vector.load %arg8[%c0_69, %c0_70] : memref<32x1xf32, #tpu.memory_space<vmem>>, vector<32x1xf32>
    %cst_71 = arith.constant dense<0.000000e+00> : vector<32x256xf32>
    %96 = tpu.matmul %93, %92, %cst_71 {dimension_numbers = #tpu.dot_dimension_numbers<[1], [0], [0], [1], [0, 0, 1, 1], [], []>} : vector<32x160xf32>, vector<160x256xf32>, vector<32x256xf32> -> vector<32x256xf32>
    %cst_72 = arith.constant dense<0.000000e+00> : vector<32xf32>
    %97 = vector.multi_reduction <add>, %96, %cst_72 [1] : vector<32x256xf32> to vector<32xf32>
    %98 = vector.shape_cast %97 : vector<32xf32> to vector<32x1xf32>
    %cst_73 = arith.constant 3.906250e-03 : f32
    %99 = vector.broadcast %cst_73 : f32 to vector<32x1xf32>
    %100 = arith.mulf %98, %99 : vector<32x1xf32>
    %101 = vector.broadcast %100 : vector<32x1xf32> to vector<32x256xf32>
    %102 = arith.subf %96, %101 : vector<32x256xf32>
    %103 = arith.mulf %102, %102 : vector<32x256xf32>
    %cst_74 = arith.constant dense<0.000000e+00> : vector<32xf32>
    %104 = vector.multi_reduction <add>, %103, %cst_74 [1] : vector<32x256xf32> to vector<32xf32>
    %105 = vector.shape_cast %104 : vector<32xf32> to vector<32x1xf32>
    %cst_75 = arith.constant 3.906250e-03 : f32
    %106 = vector.broadcast %cst_75 : f32 to vector<32x1xf32>
    %107 = arith.mulf %105, %106 : vector<32x1xf32>
    %cst_76 = arith.constant 9.99999974E-6 : f32
    %108 = vector.broadcast %cst_76 : f32 to vector<32x1xf32>
    %109 = arith.addf %107, %108 : vector<32x1xf32>
    %110 = math.rsqrt %109 : vector<32x1xf32>
    %111 = arith.mulf %94, %110 : vector<32x1xf32>
    %112 = vector.broadcast %111 : vector<32x1xf32> to vector<32x256xf32>
    %113 = arith.mulf %102, %112 : vector<32x256xf32>
    %114 = vector.broadcast %95 : vector<32x1xf32> to vector<32x256xf32>
    %115 = arith.addf %113, %114 : vector<32x256xf32>
    %cst_77 = arith.constant 0.000000e+00 : f32
    %116 = vector.broadcast %cst_77 : f32 to vector<32x256xf32>
    %117 = arith.maximumf %115, %116 : vector<32x256xf32>
    %118 = vector.extract_strided_slice %117 {offsets = [0, 0], sizes = [32, 128], strides = [1, 1]} : vector<32x256xf32> to vector<32x128xf32>
    %cst_78 = arith.constant dense<0.000000e+00> : vector<32xf32>
    %119 = vector.multi_reduction <add>, %118, %cst_78 [1] : vector<32x128xf32> to vector<32xf32>
    %120 = vector.shape_cast %119 : vector<32xf32> to vector<32x1xf32>
    %cst_79 = arith.constant 1.280000e+02 : f32
    %121 = vector.broadcast %cst_79 : f32 to vector<32x1xf32>
    %122 = arith.divf %120, %121 : vector<32x1xf32>
    %123 = vector.extract_strided_slice %117 {offsets = [0, 128], sizes = [32, 128], strides = [1, 1]} : vector<32x256xf32> to vector<32x128xf32>
    %cst_80 = arith.constant dense<0.000000e+00> : vector<32xf32>
    %124 = vector.multi_reduction <add>, %123, %cst_80 [1] : vector<32x128xf32> to vector<32xf32>
    %125 = vector.shape_cast %124 : vector<32xf32> to vector<32x1xf32>
    %cst_81 = arith.constant 1.280000e+02 : f32
    %126 = vector.broadcast %cst_81 : f32 to vector<32x1xf32>
    %127 = arith.divf %125, %126 : vector<32x1xf32>
    %128 = tpu.concatenate %122, %127 in 1 : vector<32x1xf32>, vector<32x1xf32> -> vector<32x2xf32>
    %c0_82 = arith.constant 0 : index
    %c0_83 = arith.constant 0 : index
    %129 = vector.load %arg9[%c0_82, %c0_83] : memref<32x2xf32, #tpu.memory_space<vmem>>, vector<32x2xf32>
    tpu.vector_store %arg9[%c0_82, %c0_83], %128 {strides = array<i32>} : memref<32x2xf32, #tpu.memory_space<vmem>>, vector<32x2xf32>,
    return
  }
}

</mosaic_0001>

<bundles_post_ra>
// kernel: tpu_custom_call.1
= control target key start
LH: loop header
LB: loop body
LE: loop exit
PB: predicated region body
PF: predicated region fallthrough
CT: control target
= control target key end

     0   :  { %14 = vsyncpa [#allocation4], 0  ;;  %s1746_s0 = inlined_call_operand.hbm [shape: f32[128,128], index: 0, kind: input, shape index: {}]   ;;  %s1747_s1 = inlined_call_operand.hbm [shape: f32[128,128], index: 1, kind: input, shape index: {}]   ;;  %s1748_s2 = inlined_call_operand.vmem [shape: f32[8,128], index: 2, kind: input, shape index: {}]   ;;  %s1749_s3 = inlined_call_operand.vmem [shape: f32[32,20], index: 3, kind: input, shape index: {}]   ;;  %s1750_s4 = inlined_call_operand.vmem [shape: f32[32,160], index: 4, kind: input, shape index: {}]   ;;  %s1751_s5 = inlined_call_operand.vmem [shape: f32[32,1], index: 5, kind: input, shape index: {}]   ;;  %s1752_s6 = inlined_call_operand.vmem [shape: f32[32,1], index: 6, kind: input, shape index: {}]   ;;  %s1753_s7 = inlined_call_operand.vmem [shape: f32[32,1], index: 7, kind: input, shape index: {}]   ;;  %s1754_s8 = inlined_call_operand.vmem [shape: f32[32,1], index: 8, kind: input, shape index: {}]   ;;  %s1755_s9 = inlined_call_operand.vmem [shape: f32[32,2], index: 9, kind: output, shape index: {}]  }
   0x1   :  { %s20_s11 = sshll.u32 %s1746_s0, 4  ;;  %s21_s11 = int_to_ptr.hbm [resolvable:$true] %s20_s11 }
   0x2   :  { %15 = vsyncpa [#allocation6], 0  ;;  %s1187_s12 = smov [#allocation3]   ;;  %s33_s16 = sshll.u32 %s1747_s1, 4  ;;  %s34_s16 = int_to_ptr.hbm [resolvable:$true] %s33_s16 }
   0x3   :  { %s22_s13 = sshll.u32 %s1187_s12, 4  ;;  %s1188_s17 = smov 128   ;;  %s23_s13 = int_to_ptr.vmem [resolvable:$true] %s22_s13 }
   0x4   :  { %s1189_s18 = smov 8   ;;  %s1190_s19 = smov [#allocation5]  }
   0x5   :  { %28 = dma.hbm_to_vmem [thread:$0]  %s21_s11, 2048, %s23_s13, [#allocation4], %s1188_s17, %s1188_s17, %s1189_s18  }
   0x6   :  { %s35_s20 = sshll.u32 %s1190_s19, 4  ;;  %s36_s20 = int_to_ptr.vmem [resolvable:$true] %s35_s20 }
   0x7   :  { %41 = dma.hbm_to_vmem [thread:$0]  %s34_s16, 2048, %s36_s20, [#allocation6], %s1188_s17, %s1188_s17, %s1189_s18  }
   0x8   :  { %1183 = dma.done.wait [#allocation4], 2048  }
   0x9   :  { %1184 = vsyncadd [#allocation4], 4294965248 }
   0xa   :  { %1185 = dma.done.wait [#allocation6], 2048  }
   0xb   :  { %1186 = vsyncadd [#allocation6], 4294965248  ;;  %v1249_v0 = vld [vmem:[#allocation3 + $0x78] sm:$0xff]  ;;  %v1253_v2 = vld [vmem:[#allocation3 + $0x70] sm:$0xff]  ;;  %vm237_vm0 = vcmask 1043456   ;;  %vm224_vm1 = vcmask 162816  }
   0xc   :  { %v1251_v1 = vld [vmem:[#allocation5 + $0x78] sm:$0xff]  ;;  %97 = vmatpush.msra.mxu0 %v1249_v0  ;;  %v1257_v3 = vld [vmem:[#allocation5 + $0x70] sm:$0xff]  ;;  %v1259_v4 = vld [vmem:[#allocation3 + $0x68] sm:$0xff]  ;;  %137 = vmatpush.msra.mxu2 %v1249_v0  ;;  %vm754_vm14 = vcmask 261120  }
   0xd   :  { %117 = vmatpush.msra.mxu1 %v1251_v1  ;;  %v1261_v5 = vld [vmem:[#allocation5 + $0x68] sm:$0xff]  ;;  %159 = vmatpush.msra.mxu3 %v1251_v1  ;;  %v1267_v6 = vld [vmem:[#allocation3 + $0x60] sm:$0xff]  ;;  %v1275_v8 = vld [vmem:[#allocation3 + $0x58] sm:$0xff] }
   0xe   :  { %98 = vmatpush.msra.mxu0 %v1253_v2  ;;  %v1269_v7 = vld [vmem:[#allocation5 + $0x60] sm:$0xff]  ;;  %138 = vmatpush.msra.mxu2 %v1253_v2  ;;  %v1277_v9 = vld [vmem:[#allocation5 + $0x58] sm:$0xff]  ;;  %v1283_v10 = vld [vmem:[#allocation3 + $0x50] sm:$0xff] }
   0xf   :  { %118 = vmatpush.msra.mxu1 %v1257_v3  ;;  %160 = vmatpush.msra.mxu3 %v1257_v3  ;;  %v1285_v11 = vld [vmem:[#allocation5 + $0x50] sm:$0xff]  ;;  %v1291_v12 = vld [vmem:[#allocation3 + $0x48] sm:$0xff]  ;;  %v1298_v14 = vld [vmem:[%s1748_s2] sm:$0xff] }
  0x10   :  { %99 = vmatpush.msra.mxu0 %v1259_v4  ;;  %139 = vmatpush.msra.mxu2 %v1259_v4  ;;  %v1293_v13 = vld [vmem:[#allocation5 + $0x48] sm:$0xff]  ;;  %181 = vst [vmem:[#allocation2 + $0xa8] sm:$0xf] %v1298_v14  ;;  %v183_v15 = vrot.slane %v1298_v14, 4  ;;  %v1306_v16 = vld [vmem:[#allocation3 + $0x40] sm:$0xff]  ;;  %v1314_v18 = vld [vmem:[#allocation3 + $0x38] sm:$0xff] }
  0x11   :  { %119 = vmatpush.msra.mxu1 %v1261_v5  ;;  %161 = vmatpush.msra.mxu3 %v1261_v5  ;;  %v1308_v17 = vld [vmem:[#allocation5 + $0x40] sm:$0xff]  ;;  %v1316_v19 = vld [vmem:[#allocation5 + $0x38] sm:$0xff]  ;;  %v1322_v20 = vld [vmem:[#allocation3 + $0x30] sm:$0xff] }
  0x12   :  { %100 = vmatpush.msra.mxu0 %v1267_v6  ;;  %140 = vmatpush.msra.mxu2 %v1267_v6  ;;  %185 = vst [vmem:[#allocation2 + $0xe0] sm:$0xf] %v183_v15  ;;  %v1324_v21 = vld [vmem:[#allocation5 + $0x30] sm:$0xff]  ;;  %v1330_v22 = vld [vmem:[#allocation3 + $0x28] sm:$0xff]  ;;  %v1338_v24 = vld [vmem:[#allocation3 + $0x20] sm:$0xff] }
  0x13   :  { %120 = vmatpush.msra.mxu1 %v1269_v7  ;;  %162 = vmatpush.msra.mxu3 %v1269_v7  ;;  %v1332_v23 = vld [vmem:[#allocation5 + $0x28] sm:$0xff]  ;;  %v1340_v25 = vld [vmem:[#allocation5 + $0x20] sm:$0xff]  ;;  %v1346_v26 = vld [vmem:[#allocation3 + $0x18] sm:$0xff] }
  0x14   :  { %101 = vmatpush.msra.mxu0 %v1275_v8  ;;  %141 = vmatpush.msra.mxu2 %v1275_v8  ;;  %v1348_v27 = vld [vmem:[#allocation5 + $0x18] sm:$0xff]  ;;  %v1354_v28 = vld [vmem:[#allocation3 + $0x10] sm:$0xff]  ;;  %v1362_v30 = vld [vmem:[#allocation3 + $0x8] sm:$0xff] }
  0x15   :  { %121 = vmatpush.msra.mxu1 %v1277_v9  ;;  %163 = vmatpush.msra.mxu3 %v1277_v9  ;;  %v1356_v29 = vld [vmem:[#allocation5 + $0x10] sm:$0xff]  ;;  %v1364_v31 = vld [vmem:[#allocation5 + $0x8] sm:$0xff]  ;;  %v1370_v32 = vld [vmem:[#allocation3] sm:$0xff] }
  0x16   :  { %102 = vmatpush.msra.mxu0 %v1283_v10  ;;  %142 = vmatpush.msra.mxu2 %v1283_v10  ;;  %v1372_v33 = vld [vmem:[#allocation5] sm:$0xff]  ;;  %v213_v53 = vld [vmem:[%s1749_s3 + $0x8] sm:$0xff]  ;;  %v214_v54 = vld [vmem:[%s1749_s3 + $0x10] sm:$0xff] }
  0x17   :  { %122 = vmatpush.msra.mxu1 %v1285_v11  ;;  %164 = vmatpush.msra.mxu3 %v1285_v11  ;;  %v212_v49 = vld [vmem:[%s1749_s3] sm:$0xff]  ;;  %v215_v55 = vld [vmem:[%s1749_s3 + $0x18] sm:$0xff] }
  0x18   :  { %103 = vmatpush.msra.mxu0 %v1291_v12  ;;  %143 = vmatpush.msra.mxu2 %v1291_v12 }
  0x19   :  { %123 = vmatpush.msra.mxu1 %v1293_v13  ;;  %165 = vmatpush.msra.mxu3 %v1293_v13 }
  0x1a   :  { %104 = vmatpush.msra.mxu0 %v1306_v16  ;;  %144 = vmatpush.msra.mxu2 %v1306_v16 }
  0x1b   :  { %124 = vmatpush.msra.mxu1 %v1308_v17  ;;  %166 = vmatpush.msra.mxu3 %v1308_v17 }
  0x1c   :  { %105 = vmatpush.msra.mxu0 %v1314_v18  ;;  %145 = vmatpush.msra.mxu2 %v1314_v18 }
  0x1d   :  { %125 = vmatpush.msra.mxu1 %v1316_v19  ;;  %167 = vmatpush.msra.mxu3 %v1316_v19 }
  0x1e   :  { %106 = vmatpush.msra.mxu0 %v1322_v20  ;;  %146 = vmatpush.msra.mxu2 %v1322_v20 }
  0x1f   :  { %126 = vmatpush.msra.mxu1 %v1324_v21  ;;  %168 = vmatpush.msra.mxu3 %v1324_v21 }
  0x20   :  { %107 = vmatpush.msra.mxu0 %v1330_v22  ;;  %147 = vmatpush.msra.mxu2 %v1330_v22 }
  0x21   :  { %127 = vmatpush.msra.mxu1 %v1332_v23  ;;  %169 = vmatpush.msra.mxu3 %v1332_v23 }
  0x22   :  { %108 = vmatpush.msra.mxu0 %v1338_v24  ;;  %148 = vmatpush.msra.mxu2 %v1338_v24 }
  0x23   :  { %128 = vmatpush.msra.mxu1 %v1340_v25  ;;  %170 = vmatpush.msra.mxu3 %v1340_v25 }
  0x24   :  { %109 = vmatpush.msra.mxu0 %v1346_v26  ;;  %149 = vmatpush.msra.mxu2 %v1346_v26 }
  0x25   :  { %129 = vmatpush.msra.mxu1 %v1348_v27  ;;  %171 = vmatpush.msra.mxu3 %v1348_v27 }
  0x26   :  { %110 = vmatpush.msra.mxu0 %v1354_v28  ;;  %150 = vmatpush.msra.mxu2 %v1354_v28 }
  0x27   :  { %130 = vmatpush.msra.mxu1 %v1356_v29  ;;  %172 = vmatpush.msra.mxu3 %v1356_v29 }
  0x28   :  { %111 = vmatpush.msra.mxu0 %v1362_v30  ;;  %151 = vmatpush.msra.mxu2 %v1362_v30 }
  0x29   :  { %131 = vmatpush.msra.mxu1 %v1364_v31  ;;  %173 = vmatpush.msra.mxu3 %v1364_v31 }
  0x2a   :  { %112 = vmatpush.msra.mxu0 %v1370_v32  ;;  %152 = vmatpush.msra.mxu2 %v1370_v32 }
  0x2b   :  { %132 = vmatpush.msra.mxu1 %v1372_v33  ;;  %113 = vmatmul.f32.vlgmr.msra.gmra.mxu0 %v1298_v14 }
  0x2c   :  { %133 = vmatmul.f32.vlgmr.msra.gmra.mxu1 %v1298_v14  ;;  %174 = vmatpush.msra.mxu3 %v1372_v33 }
  0x2d   :  { %462 = vmatpush.msrb.mxu2 %v1249_v0 }
  0x2e   :  { %503 = vmatpush.msrb.mxu3 %v1251_v1 }
  0x2f   :  { %463 = vmatpush.msrb.mxu2 %v1253_v2 }
  0x30   :  { %504 = vmatpush.msrb.mxu3 %v1257_v3 }
  0x31   :  { %464 = vmatpush.msrb.mxu2 %v1259_v4 }
  0x32   :  { %505 = vmatpush.msrb.mxu3 %v1261_v5 }
  0x33   :  { %465 = vmatpush.msrb.mxu2 %v1267_v6 }
  0x34   :  { %506 = vmatpush.msrb.mxu3 %v1269_v7 }
  0x35   :  { %466 = vmatpush.msrb.mxu2 %v1275_v8 }
  0x36   :  { %507 = vmatpush.msrb.mxu3 %v1277_v9 }
  0x37   :  { %467 = vmatpush.msrb.mxu2 %v1283_v10 }
  0x38   :  { %508 = vmatpush.msrb.mxu3 %v1285_v11 }
  0x39   :  { %468 = vmatpush.msrb.mxu2 %v1291_v12 }
  0x3a   :  { %509 = vmatpush.msrb.mxu3 %v1293_v13 }
  0x3b   :  { %469 = vmatpush.msrb.mxu2 %v1306_v16 }
  0x3c   :  { %510 = vmatpush.msrb.mxu3 %v1308_v17 }
  0x3d   :  { %470 = vmatpush.msrb.mxu2 %v1314_v18 }
  0x3e   :  { %511 = vmatpush.msrb.mxu3 %v1316_v19 }
  0x3f   :  { %471 = vmatpush.msrb.mxu2 %v1322_v20 }
  0x40   :  { %512 = vmatpush.msrb.mxu3 %v1324_v21 }
  0x41   :  { %472 = vmatpush.msrb.mxu2 %v1330_v22 }
  0x42   :  { %513 = vmatpush.msrb.mxu3 %v1332_v23 }
  0x43   :  { %473 = vmatpush.msrb.mxu2 %v1338_v24 }
  0x44   :  { %514 = vmatpush.msrb.mxu3 %v1340_v25 }
  0x45   :  { %474 = vmatpush.msrb.mxu2 %v1346_v26 }
  0x46   :  { %515 = vmatpush.msrb.mxu3 %v1348_v27 }
  0x47   :  { %475 = vmatpush.msrb.mxu2 %v1354_v28 }
  0x48   :  { %516 = vmatpush.msrb.mxu3 %v1356_v29 }
  0x49   :  { %476 = vmatpush.msrb.mxu2 %v1362_v30 }
  0x4a   :  { %517 = vmatpush.msrb.mxu3 %v1364_v31 }
  0x4b   :  { %477 = vmatpush.msrb.mxu2 %v1370_v32 }
  0x4c   :  { %518 = vmatpush.msrb.mxu3 %v1372_v33 }
  0xa8   :  { %v114_v34 = vpop.f32.mrf.mxu0 }
  0xa9   :  { %v134_v35 = vpop.f32.mrf.mxu1  ;;  %v187_v36 = vrot.slane %v114_v34, 4  ;;  %190 = vst [vmem:[#allocation2 + $0xe0] sm:$0xf0] %v114_v34  ;;  %153 = vmatmul.f32.vlgmr.msra.gmra.mxu2 %v114_v34 }
  0xaa   :  { %v197_v37 = vrot.slane %v134_v35, 4  ;;  %175 = vmatmul.f32.vlgmr.msra.gmra.mxu3 %v134_v35  ;;  %200 = vst [vmem:[#allocation2 + $0x50] sm:$0xf0] %v134_v35 }
  0xab   :  { %189 = vst [vmem:[#allocation2 + $0xa8] sm:$0xf0] %v187_v36 }
  0xac   :  { %199 = vst [vmem:[#allocation2 + $0x10] sm:$0xf0] %v197_v37 }
  0xb0   :  { %v207_v52 = vld [vmem:[#allocation2 + $0xe0] sm:$0xff] }
  0xb2   :  { %v206_v50 = vld [vmem:[#allocation2 + $0xa8] sm:$0xff] }
 0x12c   :  { %v154_v38 = vpop.f32.mrf.mxu2 }
 0x12d   :  { %v176_v39 = vpop.f32.mrf.mxu3  ;;  %v157_v40 = vmul.f32 2.0, %v154_v38 }
 0x12e   :  { %v179_v41 = vmul.f32 2.0, %v176_v39 }
 0x12f   :  { %v158_v42 = vsub.f32 %v157_v40, %v1298_v14 }
 0x130   :  { %v180_v43 = vsub.f32 %v179_v41, %v1298_v14 }
 0x131   :  { %191 = vst [vmem:[#allocation2 + $0x10] sm:$0xf] %v158_v42  ;;  %v193_v44 = vrot.slane %v158_v42, 4 }
 0x132   :  { %v203_v45 = vrot.slane %v180_v43, 4  ;;  %201 = vst [vmem:[#allocation2 + $0x108] sm:$0xf] %v180_v43 }
 0x133   :  { %195 = vst [vmem:[#allocation2 + $0x50] sm:$0xf] %v193_v44 }
 0x134   :  { %205 = vst [vmem:[#allocation2 + $0x38] sm:$0xf] %v203_v45 }
 0x138   :  { %v208_v47 = vld [vmem:[#allocation2 + $0x10] sm:$0xff] }
 0x139   :  { %v210_v46 = vld [vmem:[#allocation2 + $0x108] sm:$0xf] }
 0x13a   :  { %1090 = vmatpush.msk.msrb.mxu0 %vm237_vm0, %v210_v46  ;;  %v209_v51 = vld [vmem:[#allocation2 + $0x50] sm:$0xff] }
 0x13b   :  { %v211_v48 = vld [vmem:[#allocation2 + $0x38] sm:$0xf] }
 0x13c   :  { %258 = vmatpush.msrb.mxu0 %v208_v47  ;;  %1095 = vmatpush.msk.msrb.mxu1 %vm237_vm0, %v211_v48 }
 0x13e   :  { %259 = vmatpush.msrb.mxu0 %v206_v50  ;;  %287 = vmatpush.msrb.mxu1 %v209_v51  ;;  %v216_v50 = vld [vmem:[%s1751_s5] sm:$0xff] }
 0x13f   :  { %1091 = vmatmul.msk.f32.vlgmr.msrb.gmra.mxu0 %vm224_vm1, %v212_v49 }
 0x140   :  { %288 = vmatpush.msrb.mxu1 %v207_v52  ;;  %544 = vmatpush.msra.mxu0 %v1249_v0 }
 0x141   :  { %1096 = vmatmul.msk.f32.vlgmr.msrb.gmra.mxu1 %vm224_vm1, %v212_v49 }
 0x142   :  { %601 = vmatpush.msra.mxu1 %v1251_v1  ;;  %545 = vmatpush.msra.mxu0 %v1253_v2 }
 0x144   :  { %602 = vmatpush.msra.mxu1 %v1257_v3  ;;  %546 = vmatpush.msra.mxu0 %v1259_v4 }
 0x146   :  { %603 = vmatpush.msra.mxu1 %v1261_v5  ;;  %547 = vmatpush.msra.mxu0 %v1267_v6 }
 0x147   :  { %1092 = vmatmul.msk.f32.gmra.mxu0 %vm224_vm1, %v213_v53 }
 0x148   :  { %604 = vmatpush.msra.mxu1 %v1269_v7  ;;  %548 = vmatpush.msra.mxu0 %v1275_v8 }
 0x149   :  { %1097 = vmatmul.msk.f32.gmra.mxu1 %vm224_vm1, %v213_v53 }
 0x14a   :  { %605 = vmatpush.msra.mxu1 %v1277_v9  ;;  %549 = vmatpush.msra.mxu0 %v1283_v10 }
 0x14c   :  { %606 = vmatpush.msra.mxu1 %v1285_v11  ;;  %550 = vmatpush.msra.mxu0 %v1291_v12 }
 0x14e   :  { %607 = vmatpush.msra.mxu1 %v1293_v13  ;;  %551 = vmatpush.msra.mxu0 %v1306_v16 }
 0x14f   :  { %1093 = vmatmul.msk.f32.gmra.mxu0 %vm224_vm1, %v214_v54 }
 0x150   :  { %608 = vmatpush.msra.mxu1 %v1308_v17  ;;  %552 = vmatpush.msra.mxu0 %v1314_v18 }
 0x151   :  { %1098 = vmatmul.msk.f32.gmra.mxu1 %vm224_vm1, %v214_v54 }
 0x152   :  { %609 = vmatpush.msra.mxu1 %v1316_v19  ;;  %553 = vmatpush.msra.mxu0 %v1322_v20 }
 0x154   :  { %610 = vmatpush.msra.mxu1 %v1324_v21  ;;  %554 = vmatpush.msra.mxu0 %v1330_v22 }
 0x156   :  { %611 = vmatpush.msra.mxu1 %v1332_v23  ;;  %555 = vmatpush.msra.mxu0 %v1338_v24 }
 0x157   :  { %1094 = vmatmul.msk.f32.gmra.mxu0 %vm224_vm1, %v215_v55 }
 0x158   :  { %612 = vmatpush.msra.mxu1 %v1340_v25  ;;  %556 = vmatpush.msra.mxu0 %v1346_v26 }
 0x159   :  { %1099 = vmatmul.msk.f32.gmra.mxu1 %vm224_vm1, %v215_v55 }
 0x15a   :  { %613 = vmatpush.msra.mxu1 %v1348_v27  ;;  %557 = vmatpush.msra.mxu0 %v1354_v28 }
 0x15c   :  { %614 = vmatpush.msra.mxu1 %v1356_v29  ;;  %558 = vmatpush.msra.mxu0 %v1362_v30 }
 0x15e   :  { %615 = vmatpush.msra.mxu1 %v1364_v31  ;;  %559 = vmatpush.msra.mxu0 %v1370_v32  ;;  %v1191_v32 = vmov 0  }
 0x15f   :  { %1114 = vset.pattern.permute.xlu0 %v1191_v32  ;;  %1115 = vset.pattern.permute.xlu2 %v1191_v32 }
 0x160   :  { %616 = vmatpush.msra.mxu1 %v1372_v33  ;;  %v220_v33 = vld [vmem:[%s1752_s6] sm:$0xff]  ;;  %1116 = vset.pattern.permute.xlu1 %v1191_v32 }
 0x1bc   :  { %v261_v56 = vpop.f32.mrf.mxu0 }
 0x1be   :  { %v290_v57 = vpop.f32.mrf.mxu1 }
 0x1bf   :  { %v302_v58 = vadd.f32 %v290_v57, %v261_v56 }
 0x1c1   :  { %303 = vadd.xlane.f32.xlu0 %v302_v58 }
 0x1c4   :  { %v264_v59 = vpop.f32.mrf.mxu0 }
 0x1c6   :  { %v293_v60 = vpop.f32.mrf.mxu1 }
 0x1c7   :  { %v305_v61 = vadd.f32 %v293_v60, %v264_v59 }
 0x1c9   :  { %306 = vadd.xlane.f32.xlu0 %v305_v61 }
 0x1cc   :  { %v267_v62 = vpop.f32.mrf.mxu0 }
 0x1ce   :  { %v296_v63 = vpop.f32.mrf.mxu1 }
 0x1cf   :  { %v308_v0 = vadd.f32 %v296_v63, %v267_v62 }
 0x1d1   :  { %309 = vadd.xlane.f32.xlu1 %v308_v0 }
 0x1d4   :  { %v270_v1 = vpop.f32.mrf.mxu0 }
 0x1d6   :  { %v299_v2 = vpop.f32.mrf.mxu1 }
 0x1d7   :  { %v311_v3 = vadd.f32 %v299_v2, %v270_v1 }
 0x1d9   :  { %312 = vadd.xlane.f32.xlu1 %v311_v3 }
 0x234   :  { %v304_v4 = vpop.xlane.xlu0 %303 }
 0x235   :  { %v314_v5 = vmul.f32 0.00390625, %v304_v4 }
 0x237   :  { %v1472_v6 = vsub.f32 %v261_v56, %v314_v5  ;;  %v1474_v7 = vsub.f32 %v290_v57, %v314_v5 }
 0x239   :  { %v326_v8 = vmul.f32 %v1472_v6, %v1472_v6  ;;  %v327_v9 = vmul.f32 %v1474_v7, %v1474_v7 }
 0x23b   :  { %v334_v10 = vadd.f32 %v327_v9, %v326_v8 }
 0x23c   :  { %v307_v11 = vpop.xlane.xlu0 %306 }
 0x23d   :  { %v315_v12 = vmul.f32 0.00390625, %v307_v11  ;;  %335 = vadd.xlane.f32.xlu2 %v334_v10  ;;  %v218_v10 = vld [vmem:[%s1751_s5 + $0x10] sm:$0xff] }
 0x23f   :  { %v1480_v13 = vsub.f32 %v264_v59, %v315_v12  ;;  %v1482_v14 = vsub.f32 %v293_v60, %v315_v12 }
 0x241   :  { %v328_v15 = vmul.f32 %v1480_v13, %v1480_v13  ;;  %v329_v16 = vmul.f32 %v1482_v14, %v1482_v14 }
 0x243   :  { %v337_v17 = vadd.f32 %v329_v16, %v328_v15  ;;  %v222_v16 = vld [vmem:[%s1752_s6 + $0x10] sm:$0xff] }
 0x244   :  { %v310_v18 = vpop.xlane.xlu1 %309 }
 0x245   :  { %v316_v19 = vmul.f32 0.00390625, %v310_v18  ;;  %338 = vadd.xlane.f32.xlu2 %v337_v17 }
 0x247   :  { %v1488_v20 = vsub.f32 %v267_v62, %v316_v19  ;;  %v1490_v21 = vsub.f32 %v296_v63, %v316_v19  ;;  %v217_v62 = vld [vmem:[%s1751_s5 + $0x8] sm:$0xff] }
 0x249   :  { %v330_v22 = vmul.f32 %v1488_v20, %v1488_v20  ;;  %v331_v23 = vmul.f32 %v1490_v21, %v1490_v21 }
 0x24b   :  { %v340_v24 = vadd.f32 %v331_v23, %v330_v22  ;;  %v219_v22 = vld [vmem:[%s1751_s5 + $0x18] sm:$0xff] }
 0x24c   :  { %v313_v25 = vpop.xlane.xlu1 %312 }
 0x24d   :  { %v317_v26 = vmul.f32 0.00390625, %v313_v25  ;;  %341 = vadd.xlane.f32.xlu0 %v340_v24  ;;  %v223_v24 = vld [vmem:[%s1752_s6 + $0x18] sm:$0xff] }
 0x24f   :  { %v1496_v27 = vsub.f32 %v270_v1, %v317_v26  ;;  %v1498_v28 = vsub.f32 %v299_v2, %v317_v26  ;;  %v221_v1 = vld [vmem:[%s1752_s6 + $0x8] sm:$0xff] }
 0x251   :  { %v332_v29 = vmul.f32 %v1496_v27, %v1496_v27  ;;  %v333_v30 = vmul.f32 %v1498_v28, %v1498_v28 }
 0x253   :  { %v343_v31 = vadd.f32 %v333_v30, %v332_v29 }
 0x255   :  { %344 = vadd.xlane.f32.xlu1 %v343_v31 }
 0x261   :  { %428 = vperm.xlu0 %1114, %v220_v33  }
 0x2b0   :  { %v336_v34 = vpop.xlane.xlu2 %335 }
 0x2b1   :  { %v346_v35 = vmul.f32 0.00390625, %v336_v34 }
 0x2b3   :  { %v350_v36 = vadd.f32 1e-05, %v346_v35 }
 0x2b5   :  { %1117 = vrsqrt.f32 %v350_v36  ;;  %vm360_vm3 = vweird.f32 %v350_v36 }
 0x2b8   :  { %v339_v37 = vpop.xlane.xlu2 %338 }
 0x2b9   :  { %v347_v38 = vmul.f32 0.00390625, %v339_v37 }
 0x2bb   :  { %v1118_v39 = vpop.eup %1117  ;;  %v351_v40 = vadd.f32 1e-05, %v347_v38 }
 0x2bc   :  { %v355_v41 = vmul.f32 %v1118_v39, %v350_v36  ;;  %vm361_vm2 = vweird.f32 %v1118_v39 }
 0x2bd   :  { %1119 = vrsqrt.f32 %v351_v40  ;;  %vm362_vm4 = vmor %vm360_vm3, %vm361_vm2  ;;  %vm370_vm6 = vweird.f32 %v351_v40 }
 0x2be   :  { %v356_v42 = vmul.f32 %v1118_v39, %v355_v41 }
 0x2c0   :  { %v357_v43 = vmul.f32 0.5, %v356_v42  ;;  %v342_v44 = vpop.xlane.xlu0 %341 }
 0x2c1   :  { %v348_v45 = vmul.f32 0.00390625, %v342_v44 }
 0x2c2   :  { %v358_v46 = vsub.f32 1.5, %v357_v43 }
 0x2c3   :  { %v1120_v47 = vpop.eup %1119  ;;  %v352_v48 = vadd.f32 1e-05, %v348_v45 }
 0x2c4   :  { %v365_v49 = vmul.f32 %v1120_v47, %v351_v40  ;;  %v359_v51 = vmul.f32 %v1118_v39, %v358_v46  ;;  %vm371_vm5 = vweird.f32 %v1120_v47 }
 0x2c5   :  { %1121 = vrsqrt.f32 %v352_v48  ;;  %vm372_vm7 = vmor %vm370_vm6, %vm371_vm5  ;;  %vm380_vm9 = vweird.f32 %v352_v48 }
 0x2c6   :  { %v366_v52 = vmul.f32 %v1120_v47, %v365_v49  ;;  %v363_v53 = vsel %vm362_vm4, %v1118_v39, %v359_v51 }
 0x2c7   :  { %v394_v54 = vmul.f32 %v363_v53, %v216_v50 }
 0x2c8   :  { %v367_v55 = vmul.f32 0.5, %v366_v52  ;;  %v345_v56 = vpop.xlane.xlu1 %344 }
 0x2c9   :  { %v349_v57 = vmul.f32 0.00390625, %v345_v56  ;;  %400 = vperm.xlu2 %1115, %v394_v54  }
 0x2ca   :  { %v368_v58 = vsub.f32 1.5, %v367_v55 }
 0x2cb   :  { %v1122_v59 = vpop.eup %1121  ;;  %v353_v60 = vadd.f32 1e-05, %v349_v57 }
 0x2cc   :  { %v375_v61 = vmul.f32 %v1122_v59, %v352_v48  ;;  %v369_v63 = vmul.f32 %v1120_v47, %v368_v58  ;;  %vm381_vm8 = vweird.f32 %v1122_v59 }
 0x2cd   :  { %1123 = vrsqrt.f32 %v353_v60  ;;  %vm382_vm10 = vmor %vm380_vm9, %vm381_vm8  ;;  %vm390_vm12 = vweird.f32 %v353_v60 }
 0x2ce   :  { %v376_v0 = vmul.f32 %v1122_v59, %v375_v61  ;;  %v373_v2 = vsel %vm372_vm7, %v1120_v47, %v369_v63 }
 0x2cf   :  { %v395_v3 = vmul.f32 %v373_v2, %v217_v62 }
 0x2d0   :  { %v377_v4 = vmul.f32 0.5, %v376_v0 }
 0x2d1   :  { %433 = vperm.xlu2 %1115, %v221_v1   ;;  %405 = vperm.xlu1 %1116, %v395_v3  }
 0x2d2   :  { %v378_v5 = vsub.f32 1.5, %v377_v4 }
 0x2d3   :  { %v1124_v8 = vpop.eup %1123  ;;  %v429_v30 = vpop.permute.xlu0 %428 }
 0x2d4   :  { %v385_v9 = vmul.f32 %v1124_v8, %v353_v60  ;;  %v379_v11 = vmul.f32 %v1122_v59, %v378_v5  ;;  %vm391_vm11 = vweird.f32 %v1124_v8 }
 0x2d5   :  { %vm392_vm13 = vmor %vm390_vm12, %vm391_vm11  ;;  %vm1074_vm12 = vcmask 7168  }
 0x2d6   :  { %v386_v12 = vmul.f32 %v1124_v8, %v385_v9  ;;  %v383_v15 = vsel %vm382_vm10, %v1122_v59, %v379_v11 }
 0x2d7   :  { %v396_v17 = vmul.f32 %v383_v15, %v218_v10 }
 0x2d8   :  { %v387_v18 = vmul.f32 0.5, %v386_v12 }
 0x2d9   :  { %410 = vperm.xlu2 %1115, %v396_v17   ;;  %438 = vperm.xlu1 %1116, %v222_v16  }
 0x2da   :  { %v388_v19 = vsub.f32 1.5, %v387_v18 }
 0x2dc   :  { %v389_v23 = vmul.f32 %v1124_v8, %v388_v19 }
 0x2de   :  { %v393_v25 = vsel %vm392_vm13, %v1124_v8, %v389_v23  ;;  %vm1079_vm13 = vcmask 15360  }
 0x2df   :  { %v397_v26 = vmul.f32 %v393_v25, %v219_v22 }
 0x2e1   :  { %443 = vperm.xlu1 %1116, %v223_v24   ;;  %415 = vperm.xlu2 %1115, %v397_v26  }
 0x323   :  { %v401_v29 = vpop.permute.xlu2 %400 }
 0x324   :  { %v418_v31 = vmul.f32 %v401_v29, %v1472_v6  ;;  %v419_v32 = vmul.f32 %v401_v29, %v1474_v7 }
 0x326   :  { %v446_v33 = vadd.f32 %v429_v30, %v418_v31  ;;  %v447_v34 = vadd.f32 %v429_v30, %v419_v32 }
 0x328   :  { %v1530_v35 = vmax.f32 %v446_v33, 0.0  ;;  %v1532_v36 = vmax.f32 %v447_v34, 0.0 }
 0x32a   :  { %658 = vst [vmem:[#allocation2 + $0xa8] sm:$0xff] %v1530_v35  ;;  %478 = vmatmul.f32.vlgmr.msrb.gmra.mxu2 %v1530_v35  ;;  %519 = vmatmul.f32.vlgmr.msrb.gmra.mxu3 %v1530_v35 }
 0x32b   :  { %662 = vst [vmem:[#allocation2 + $0xe0] sm:$0xff] %v1532_v36  ;;  %v434_v37 = vpop.permute.xlu2 %433 }
 0x333   :  { %v411_v39 = vpop.permute.xlu2 %410 }
 0x334   :  { %v422_v44 = vmul.f32 %v411_v39, %v1488_v20  ;;  %v423_v45 = vmul.f32 %v411_v39, %v1490_v21 }
 0x33b   :  { %v416_v49 = vpop.permute.xlu2 %415 }
 0x33c   :  { %v424_v20 = vmul.f32 %v416_v49, %v1496_v27  ;;  %v425_v21 = vmul.f32 %v416_v49, %v1498_v28 }
 0x343   :  { %v406_v38 = vpop.permute.xlu1 %405 }
 0x344   :  { %v420_v6 = vmul.f32 %v406_v38, %v1480_v13  ;;  %v421_v7 = vmul.f32 %v406_v38, %v1482_v14 }
 0x346   :  { %v448_v40 = vadd.f32 %v434_v37, %v420_v6  ;;  %v449_v41 = vadd.f32 %v434_v37, %v421_v7 }
 0x348   :  { %v1540_v42 = vmax.f32 %v448_v40, 0.0  ;;  %v1542_v43 = vmax.f32 %v449_v41, 0.0 }
 0x34a   :  { %659 = vst [vmem:[#allocation2 + $0x10] sm:$0xff] %v1540_v42  ;;  %481 = vmatmul.f32.gmra.mxu2 %v1540_v42  ;;  %522 = vmatmul.f32.gmra.mxu3 %v1540_v42 }
 0x34b   :  { %663 = vst [vmem:[#allocation2 + $0x50] sm:$0xff] %v1542_v43  ;;  %v439_v13 = vpop.permute.xlu1 %438 }
 0x34c   :  { %v450_v14 = vadd.f32 %v439_v13, %v422_v44  ;;  %v451_v46 = vadd.f32 %v439_v13, %v423_v45 }
 0x34e   :  { %v1550_v47 = vmax.f32 %v450_v14, 0.0  ;;  %v1552_v48 = vmax.f32 %v451_v46, 0.0 }
 0x350   :  { %660 = vst [vmem:[#allocation2 + $0x108] sm:$0xff] %v1550_v47 }
 0x351   :  { %664 = vst [vmem:[#allocation2 + $0x38] sm:$0xff] %v1552_v48 }
 0x352   :  { %484 = vmatmul.f32.gmra.mxu2 %v1550_v47  ;;  %525 = vmatmul.f32.gmra.mxu3 %v1550_v47 }
 0x353   :  { %v444_v50 = vpop.permute.xlu1 %443 }
 0x354   :  { %v452_v51 = vadd.f32 %v444_v50, %v424_v20  ;;  %v453_v52 = vadd.f32 %v444_v50, %v425_v21  ;;  %v739_v21 = vld [vmem:[%s1750_s4 + $0x8] sm:$0xff] }
 0x356   :  { %v1560_v53 = vmax.f32 %v452_v51, 0.0  ;;  %v1562_v54 = vmax.f32 %v453_v52, 0.0 }
 0x35a   :  { %487 = vmatmul.f32.gmra.mxu2 %v1560_v53  ;;  %528 = vmatmul.f32.gmra.mxu3 %v1560_v53 }
 0x362   :  { %490 = vmatmul.f32.gmra.mxu2 %v1532_v36  ;;  %531 = vmatmul.f32.gmra.mxu3 %v1532_v36 }
 0x36a   :  { %493 = vmatmul.f32.gmra.mxu2 %v1542_v43  ;;  %534 = vmatmul.f32.gmra.mxu3 %v1542_v43 }
 0x372   :  { %496 = vmatmul.f32.gmra.mxu2 %v1552_v48  ;;  %537 = vmatmul.f32.gmra.mxu3 %v1552_v48 }
 0x37a   :  { %499 = vmatmul.f32.gmra.mxu2 %v1562_v54  ;;  %540 = vmatmul.f32.gmra.mxu3 %v1562_v54 }
 0x3ad   :  { %v1574_v27 = vpop.f32.mrf.mxu2  ;;  %v520_v28 = vpop.f32.mrf.mxu3 }
 0x3ae   :  { %560 = vmatmul.f32.vlgmr.msra.gmra.mxu0 %v1574_v27  ;;  %617 = vmatmul.f32.vlgmr.msra.gmra.mxu1 %v520_v28 }
 0x3cd   :  { %v1577_v55 = vpop.f32.mrf.mxu2  ;;  %v523_v56 = vpop.f32.mrf.mxu3 }
 0x3ce   :  { %563 = vmatmul.f32.gmra.mxu0 %v1577_v55  ;;  %620 = vmatmul.f32.gmra.mxu1 %v523_v56 }
 0x3d5   :  { %v1580_v57 = vpop.f32.mrf.mxu2  ;;  %v526_v58 = vpop.f32.mrf.mxu3 }
 0x3d6   :  { %566 = vmatmul.f32.gmra.mxu0 %v1580_v57  ;;  %623 = vmatmul.f32.gmra.mxu1 %v526_v58 }
 0x3dd   :  { %v1583_v59 = vpop.f32.mrf.mxu2  ;;  %v529_v60 = vpop.f32.mrf.mxu3 }
 0x3de   :  { %569 = vmatmul.f32.gmra.mxu0 %v1583_v59  ;;  %626 = vmatmul.f32.gmra.mxu1 %v529_v60 }
 0x3df   :  { %767 = vmatpush.msra.mxu2 %v529_v60 }
 0x3e1   :  { %768 = vmatpush.msra.mxu2 %v526_v58 }
 0x3e3   :  { %769 = vmatpush.msra.mxu2 %v523_v56 }
 0x3e5   :  { %v1586_v61 = vpop.f32.mrf.mxu2  ;;  %v532_v62 = vpop.f32.mrf.mxu3  ;;  %770 = vmatpush.msra.mxu2 %v520_v28 }
 0x3e6   :  { %572 = vmatmul.f32.gmra.mxu0 %v1586_v61  ;;  %629 = vmatmul.f32.gmra.mxu1 %v532_v62 }
 0x3ed   :  { %v1589_v63 = vpop.f32.mrf.mxu2  ;;  %v535_v0 = vpop.f32.mrf.mxu3 }
 0x3ee   :  { %575 = vmatmul.f32.gmra.mxu0 %v1589_v63  ;;  %632 = vmatmul.f32.gmra.mxu1 %v535_v0 }
 0x3f5   :  { %v1592_v1 = vpop.f32.mrf.mxu2  ;;  %v538_v2 = vpop.f32.mrf.mxu3 }
 0x3f6   :  { %578 = vmatmul.f32.gmra.mxu0 %v1592_v1  ;;  %635 = vmatmul.f32.gmra.mxu1 %v538_v2 }
 0x3fd   :  { %v1595_v3 = vpop.f32.mrf.mxu2  ;;  %v541_v4 = vpop.f32.mrf.mxu3 }
 0x3fe   :  { %581 = vmatmul.f32.gmra.mxu0 %v1595_v3  ;;  %638 = vmatmul.f32.gmra.mxu1 %v541_v4 }
 0x3ff   :  { %825 = vmatpush.msrb.mxu0 %v541_v4  ;;  %v744_v4 = vld [vmem:[%s1750_s4 + $0x30] sm:$0xff] }
 0x401   :  { %826 = vmatpush.msrb.mxu0 %v538_v2  ;;  %v745_v2 = vld [vmem:[%s1750_s4 + $0x38] sm:$0xff] }
 0x403   :  { %827 = vmatpush.msrb.mxu0 %v535_v0  ;;  %v742_v0 = vld [vmem:[%s1750_s4 + $0x20] sm:$0xff] }
 0x405   :  { %828 = vmatpush.msrb.mxu0 %v532_v62 }
 0x42b   :  { %v561_v5 = vpop.f32.mrf.mxu0  ;;  %v618_v8 = vpop.f32.mrf.mxu1 }
 0x42c   :  { %v585_v9 = vmul.f32 2.0, %v561_v5  ;;  %v642_v10 = vmul.f32 2.0, %v618_v8 }
 0x42e   :  { %v593_v11 = vsub.f32 %v585_v9, %v1530_v35  ;;  %v650_v12 = vsub.f32 %v642_v10, %v1530_v35 }
 0x44b   :  { %v564_v15 = vpop.f32.mrf.mxu0  ;;  %v621_v16 = vpop.f32.mrf.mxu1 }
 0x44c   :  { %v586_v17 = vmul.f32 2.0, %v564_v15  ;;  %v643_v18 = vmul.f32 2.0, %v621_v16 }
 0x44e   :  { %v594_v19 = vsub.f32 %v586_v17, %v1540_v42  ;;  %v651_v22 = vsub.f32 %v643_v18, %v1540_v42 }
 0x453   :  { %v567_v23 = vpop.f32.mrf.mxu0  ;;  %v624_v24 = vpop.f32.mrf.mxu1 }
 0x454   :  { %v587_v25 = vmul.f32 2.0, %v567_v23  ;;  %v644_v26 = vmul.f32 2.0, %v624_v24 }
 0x456   :  { %v595_v29 = vsub.f32 %v587_v25, %v1550_v47  ;;  %v652_v30 = vsub.f32 %v644_v26, %v1550_v47 }
 0x45b   :  { %v570_v31 = vpop.f32.mrf.mxu0  ;;  %v627_v32 = vpop.f32.mrf.mxu1 }
 0x45c   :  { %v588_v33 = vmul.f32 2.0, %v570_v31  ;;  %v645_v34 = vmul.f32 2.0, %v627_v32 }
 0x45e   :  { %v596_v37 = vsub.f32 %v588_v33, %v1560_v53  ;;  %v653_v38 = vsub.f32 %v645_v34, %v1560_v53 }
 0x460   :  { %771 = vmatpush.msra.mxu2 %v596_v37  ;;  %808 = vmatpush.msra.mxu3 %v653_v38 }
 0x462   :  { %772 = vmatpush.msra.mxu2 %v595_v29  ;;  %809 = vmatpush.msra.mxu3 %v652_v30 }
 0x463   :  { %v573_v6 = vpop.f32.mrf.mxu0  ;;  %v630_v7 = vpop.f32.mrf.mxu1 }
 0x464   :  { %v589_v39 = vmul.f32 2.0, %v573_v6  ;;  %v646_v40 = vmul.f32 2.0, %v630_v7  ;;  %773 = vmatpush.msra.mxu2 %v594_v19  ;;  %810 = vmatpush.msra.mxu3 %v651_v22 }
 0x466   :  { %v597_v41 = vsub.f32 %v589_v39, %v1532_v36  ;;  %v654_v44 = vsub.f32 %v646_v40, %v1532_v36  ;;  %774 = vmatpush.msra.mxu2 %v593_v11  ;;  %811 = vmatpush.msra.mxu3 %v650_v12 }
 0x467   :  { %1100 = vmatmul.msk.f32.vlgmr.msra.gmra.mxu3 %vm754_vm14, %v739_v21 }
 0x468   :  { %775 = vmatpush.msra.mxu2 %v1583_v59  ;;  %v740_v59 = vld [vmem:[%s1750_s4 + $0x10] sm:$0xff] }
 0x46a   :  { %776 = vmatpush.msra.mxu2 %v1580_v57 }
 0x46b   :  { %v576_v45 = vpop.f32.mrf.mxu0  ;;  %v633_v13 = vpop.f32.mrf.mxu1 }
 0x46c   :  { %v590_v14 = vmul.f32 2.0, %v576_v45  ;;  %v647_v46 = vmul.f32 2.0, %v633_v13  ;;  %777 = vmatpush.msra.mxu2 %v1577_v55 }
 0x46e   :  { %v598_v49 = vsub.f32 %v590_v14, %v1542_v43  ;;  %v655_v20 = vsub.f32 %v647_v46, %v1542_v43  ;;  %778 = vmatpush.msra.mxu2 %v1574_v27  ;;  %v738_v27 = vld [vmem:[%s1750_s4] sm:$0xff] }
 0x470   :  { %779 = vmatpush.msra.mxu2 %v1560_v53 }
 0x472   :  { %780 = vmatpush.msra.mxu2 %v1550_v47  ;;  %v741_v47 = vld [vmem:[%s1750_s4 + $0x18] sm:$0xff] }
 0x473   :  { %v579_v50 = vpop.f32.mrf.mxu0  ;;  %v636_v51 = vpop.f32.mrf.mxu1  ;;  %1101 = vmatmul.msk.f32.gmra.mxu3 %vm754_vm14, %v741_v47 }
 0x474   :  { %v591_v52 = vmul.f32 2.0, %v579_v50  ;;  %v648_v28 = vmul.f32 2.0, %v636_v51  ;;  %781 = vmatpush.msra.mxu2 %v1540_v42 }
 0x476   :  { %v599_v53 = vsub.f32 %v591_v52, %v1552_v48  ;;  %v656_v55 = vsub.f32 %v648_v28, %v1552_v48  ;;  %782 = vmatpush.msra.mxu2 %v1530_v35  ;;  %v743_v35 = vld [vmem:[%s1750_s4 + $0x28] sm:$0xff] }
 0x477   :  { %783 = vmatmul.f32.vlgmr.msra.gmra.mxu2 %v738_v27 }
 0x47b   :  { %v582_v56 = vpop.f32.mrf.mxu0  ;;  %v639_v57 = vpop.f32.mrf.mxu1  ;;  %1102 = vmatmul.msk.f32.gmra.mxu3 %vm754_vm14, %v743_v35 }
 0x47c   :  { %v592_v42 = vmul.f32 2.0, %v582_v56  ;;  %v649_v58 = vmul.f32 2.0, %v639_v57 }
 0x47e   :  { %v600_v60 = vsub.f32 %v592_v42, %v1562_v54  ;;  %v657_v62 = vsub.f32 %v649_v58, %v1562_v54  ;;  %v750_v58 = vld [vmem:[%s1754_s8] sm:$0xff] }
 0x47f   :  { %786 = vmatmul.f32.gmra.mxu2 %v740_v59 }
 0x480   :  { %829 = vmatpush.msrb.mxu0 %v600_v60  ;;  %866 = vmatpush.msrb.mxu1 %v657_v62 }
 0x482   :  { %830 = vmatpush.msrb.mxu0 %v599_v53  ;;  %867 = vmatpush.msrb.mxu1 %v656_v55 }
 0x483   :  { %1103 = vmatmul.msk.f32.gmra.mxu3 %vm754_vm14, %v745_v2 }
 0x484   :  { %831 = vmatpush.msrb.mxu0 %v598_v49  ;;  %868 = vmatpush.msrb.mxu1 %v655_v20 }
 0x486   :  { %832 = vmatpush.msrb.mxu0 %v597_v41  ;;  %869 = vmatpush.msrb.mxu1 %v654_v44 }
 0x487   :  { %1104 = vmatmul.msk.f32.vlgmr.msrb.gmra.mxu1 %vm754_vm14, %v739_v21  ;;  %789 = vmatmul.f32.gmra.mxu2 %v742_v0 }
 0x488   :  { %833 = vmatpush.msrb.mxu0 %v1595_v3 }
 0x48a   :  { %834 = vmatpush.msrb.mxu0 %v1592_v1 }
 0x48c   :  { %835 = vmatpush.msrb.mxu0 %v1589_v63 }
 0x48e   :  { %836 = vmatpush.msrb.mxu0 %v1586_v61 }
 0x48f   :  { %1105 = vmatmul.msk.f32.gmra.mxu1 %vm754_vm14, %v741_v47  ;;  %792 = vmatmul.f32.gmra.mxu2 %v744_v4 }
 0x490   :  { %837 = vmatpush.msrb.mxu0 %v1562_v54 }
 0x492   :  { %838 = vmatpush.msrb.mxu0 %v1552_v48 }
 0x494   :  { %839 = vmatpush.msrb.mxu0 %v1542_v43 }
 0x496   :  { %840 = vmatpush.msrb.mxu0 %v1532_v36 }
 0x497   :  { %841 = vmatmul.f32.vlgmr.msrb.gmra.mxu0 %v738_v27  ;;  %1106 = vmatmul.msk.f32.gmra.mxu1 %vm754_vm14, %v743_v35 }
 0x49f   :  { %844 = vmatmul.f32.gmra.mxu0 %v740_v59  ;;  %1107 = vmatmul.msk.f32.gmra.mxu1 %vm754_vm14, %v745_v2 }
 0x4a7   :  { %847 = vmatmul.f32.gmra.mxu0 %v742_v0 }
 0x4af   :  { %850 = vmatmul.f32.gmra.mxu0 %v744_v4 }
 0x4ea   :  { %v813_v61 = vpop.f32.mrf.mxu3 }
 0x4f6   :  { %v816_v5 = vpop.f32.mrf.mxu3 }
 0x4fa   :  { %v784_v63 = vpop.f32.mrf.mxu2 }
 0x4fb   :  { %v814_v3 = vadd.f32 %v813_v61, %v784_v63 }
 0x4fe   :  { %v819_v15 = vpop.f32.mrf.mxu3 }
 0x502   :  { %v787_v8 = vpop.f32.mrf.mxu2 }
 0x503   :  { %v817_v36 = vadd.f32 %v816_v5, %v787_v8 }
 0x504   :  { %v871_v1 = vpop.f32.mrf.mxu1 }
 0x506   :  { %v822_v25 = vpop.f32.mrf.mxu3 }
 0x50a   :  { %v790_v12 = vpop.f32.mrf.mxu2 }
 0x50b   :  { %v820_v18 = vadd.f32 %v819_v15, %v790_v12 }
 0x50c   :  { %v874_v9 = vpop.f32.mrf.mxu1 }
 0x512   :  { %v793_v24 = vpop.f32.mrf.mxu2 }
 0x513   :  { %v823_v29 = vadd.f32 %v822_v25, %v793_v24  ;;  %v747_v24 = vld [vmem:[%s1753_s7 + $0x8] sm:$0xff] }
 0x514   :  { %v842_v54 = vpop.f32.mrf.mxu0  ;;  %v877_v17 = vpop.f32.mrf.mxu1 }
 0x515   :  { %v872_v48 = vadd.f32 %v871_v1, %v842_v54 }
 0x517   :  { %v883_v43 = vadd.f32 %v872_v48, %v814_v3 }
 0x519   :  { %884 = vadd.xlane.f32.xlu0 %v883_v43  ;;  %v746_v43 = vld [vmem:[%s1753_s7] sm:$0xff] }
 0x51c   :  { %v845_v10 = vpop.f32.mrf.mxu0  ;;  %v880_v26 = vpop.f32.mrf.mxu1 }
 0x51d   :  { %v875_v11 = vadd.f32 %v874_v9, %v845_v10 }
 0x51f   :  { %v886_v16 = vadd.f32 %v875_v11, %v817_v36 }
 0x521   :  { %887 = vadd.xlane.f32.xlu2 %v886_v16 }
 0x524   :  { %v848_v19 = vpop.f32.mrf.mxu0 }
 0x525   :  { %v878_v22 = vadd.f32 %v877_v17, %v848_v19 }
 0x527   :  { %v889_v23 = vadd.f32 %v878_v22, %v820_v18 }
 0x529   :  { %890 = vadd.xlane.f32.xlu1 %v889_v23 }
 0x52c   :  { %v851_v30 = vpop.f32.mrf.mxu0 }
 0x52d   :  { %v881_v31 = vadd.f32 %v880_v26, %v851_v30 }
 0x52f   :  { %v892_v32 = vadd.f32 %v881_v31, %v823_v29 }
 0x531   :  { %893 = vadd.xlane.f32.xlu2 %v892_v32 }
 0x58c   :  { %v885_v33 = vpop.xlane.xlu0 %884 }
 0x58d   :  { %v895_v34 = vmul.f32 0.00390625, %v885_v33 }
 0x58f   :  { %v1662_v37 = vsub.f32 %v814_v3, %v895_v34  ;;  %v1664_v38 = vsub.f32 %v872_v48, %v895_v34 }
 0x591   :  { %v907_v6 = vmul.f32 %v1662_v37, %v1662_v37  ;;  %v908_v7 = vmul.f32 %v1664_v38, %v1664_v38 }
 0x593   :  { %v915_v39 = vadd.f32 %v908_v7, %v907_v6  ;;  %v748_v6 = vld [vmem:[%s1753_s7 + $0x10] sm:$0xff] }
 0x594   :  { %v888_v40 = vpop.xlane.xlu2 %887 }
 0x595   :  { %v896_v41 = vmul.f32 0.00390625, %v888_v40  ;;  %916 = vadd.xlane.f32.xlu0 %v915_v39  ;;  %v751_v40 = vld [vmem:[%s1754_s8 + $0x8] sm:$0xff] }
 0x597   :  { %v1670_v44 = vsub.f32 %v817_v36, %v896_v41  ;;  %v1672_v45 = vsub.f32 %v875_v11, %v896_v41 }
 0x599   :  { %v909_v13 = vmul.f32 %v1670_v44, %v1670_v44  ;;  %v910_v14 = vmul.f32 %v1672_v45, %v1672_v45 }
 0x59b   :  { %v918_v46 = vadd.f32 %v910_v14, %v909_v13 }
 0x59c   :  { %v891_v49 = vpop.xlane.xlu1 %890 }
 0x59d   :  { %v897_v20 = vmul.f32 0.00390625, %v891_v49  ;;  %919 = vadd.xlane.f32.xlu1 %v918_v46  ;;  %v749_v49 = vld [vmem:[%s1753_s7 + $0x18] sm:$0xff] }
 0x59f   :  { %v1678_v21 = vsub.f32 %v820_v18, %v897_v20  ;;  %v1680_v50 = vsub.f32 %v878_v22, %v897_v20 }
 0x5a1   :  { %v911_v51 = vmul.f32 %v1678_v21, %v1678_v21  ;;  %v912_v52 = vmul.f32 %v1680_v50, %v1680_v50 }
 0x5a3   :  { %v921_v28 = vadd.f32 %v912_v52, %v911_v51  ;;  %v753_v52 = vld [vmem:[%s1754_s8 + $0x18] sm:$0xff] }
 0x5a4   :  { %v894_v27 = vpop.xlane.xlu2 %893 }
 0x5a5   :  { %v898_v53 = vmul.f32 0.00390625, %v894_v27  ;;  %922 = vadd.xlane.f32.xlu2 %v921_v28  ;;  %v752_v27 = vld [vmem:[%s1754_s8 + $0x10] sm:$0xff] }
 0x5a7   :  { %v1686_v55 = vsub.f32 %v823_v29, %v898_v53  ;;  %v1688_v47 = vsub.f32 %v881_v31, %v898_v53 }
 0x5a9   :  { %v913_v56 = vmul.f32 %v1686_v55, %v1686_v55  ;;  %v914_v57 = vmul.f32 %v1688_v47, %v1688_v47 }
 0x5ab   :  { %v924_v42 = vadd.f32 %v914_v57, %v913_v56 }
 0x5ad   :  { %925 = vadd.xlane.f32.xlu0 %v924_v42 }
 0x5c1   :  { %1009 = vperm.xlu0 %1114, %v750_v58  }
 0x608   :  { %v917_v59 = vpop.xlane.xlu0 %916 }
 0x609   :  { %v927_v60 = vmul.f32 0.00390625, %v917_v59 }
 0x60b   :  { %v931_v62 = vadd.f32 1e-05, %v927_v60 }
 0x60d   :  { %1125 = vrsqrt.f32 %v931_v62  ;;  %vm941_vm0 = vweird.f32 %v931_v62 }
 0x610   :  { %v920_v35 = vpop.xlane.xlu1 %919 }
 0x611   :  { %v928_v0 = vmul.f32 0.00390625, %v920_v35 }
 0x613   :  { %v1126_v2 = vpop.eup %1125  ;;  %v932_v4 = vadd.f32 1e-05, %v928_v0 }
 0x614   :  { %v936_v61 = vmul.f32 %v1126_v2, %v931_v62  ;;  %vm942_vm15 = vweird.f32 %v1126_v2 }
 0x615   :  { %1127 = vrsqrt.f32 %v932_v4  ;;  %vm943_vm1 = vmor %vm941_vm0, %vm942_vm15  ;;  %vm951_vm3 = vweird.f32 %v932_v4 }
 0x616   :  { %v937_v63 = vmul.f32 %v1126_v2, %v936_v61 }
 0x618   :  { %v938_v1 = vmul.f32 0.5, %v937_v63  ;;  %v923_v3 = vpop.xlane.xlu2 %922 }
 0x619   :  { %v929_v5 = vmul.f32 0.00390625, %v923_v3 }
 0x61a   :  { %v939_v54 = vsub.f32 1.5, %v938_v1 }
 0x61b   :  { %v1128_v8 = vpop.eup %1127  ;;  %v933_v48 = vadd.f32 1e-05, %v929_v5 }
 0x61c   :  { %v946_v9 = vmul.f32 %v1128_v8, %v932_v4  ;;  %v940_v36 = vmul.f32 %v1126_v2, %v939_v54  ;;  %vm952_vm2 = vweird.f32 %v1128_v8 }
 0x61d   :  { %1129 = vrsqrt.f32 %v933_v48  ;;  %vm953_vm4 = vmor %vm951_vm3, %vm952_vm2  ;;  %vm961_vm6 = vweird.f32 %v933_v48 }
 0x61e   :  { %v947_v10 = vmul.f32 %v1128_v8, %v946_v9  ;;  %v944_v11 = vsel %vm943_vm1, %v1126_v2, %v940_v36 }
 0x61f   :  { %v975_v12 = vmul.f32 %v944_v11, %v746_v43 }
 0x620   :  { %v948_v15 = vmul.f32 0.5, %v947_v10  ;;  %v926_v16 = vpop.xlane.xlu0 %925 }
 0x621   :  { %v930_v17 = vmul.f32 0.00390625, %v926_v16  ;;  %981 = vperm.xlu1 %1116, %v975_v12   ;;  %v1192_v16 = vmov 128.0  }
 0x622   :  { %v949_v18 = vsub.f32 1.5, %v948_v15 }
 0x623   :  { %v1130_v19 = vpop.eup %1129  ;;  %v934_v22 = vadd.f32 1e-05, %v930_v17 }
 0x624   :  { %v956_v23 = vmul.f32 %v1130_v19, %v933_v48  ;;  %v950_v25 = vmul.f32 %v1128_v8, %v949_v18  ;;  %vm962_vm5 = vweird.f32 %v1130_v19 }
 0x625   :  { %1131 = vrsqrt.f32 %v934_v22  ;;  %vm963_vm7 = vmor %vm961_vm6, %vm962_vm5  ;;  %vm971_vm9 = vweird.f32 %v934_v22 }
 0x626   :  { %v957_v26 = vmul.f32 %v1130_v19, %v956_v23  ;;  %v954_v29 = vsel %vm953_vm4, %v1128_v8, %v950_v25  ;;  %1133 = vrcp.f32 %v1192_v16 }
 0x627   :  { %v976_v30 = vmul.f32 %v954_v29, %v747_v24 }
 0x628   :  { %v958_v31 = vmul.f32 0.5, %v957_v26 }
 0x629   :  { %986 = vperm.xlu2 %1115, %v976_v30  }
 0x62a   :  { %v959_v32 = vsub.f32 1.5, %v958_v31 }
 0x62b   :  { %v1132_v33 = vpop.eup %1131 }
 0x62c   :  { %v966_v34 = vmul.f32 %v1132_v33, %v934_v22  ;;  %v960_v7 = vmul.f32 %v1130_v19, %v959_v32  ;;  %vm972_vm8 = vweird.f32 %v1132_v33  ;;  %v1134_v17 = vpop.eup %1133 }
 0x62d   :  { %vm973_vm10 = vmor %vm971_vm9, %vm972_vm8  ;;  %vm1056_vm11 = vweird.f32 %v1134_v17 }
 0x62e   :  { %v967_v39 = vmul.f32 %v1132_v33, %v966_v34  ;;  %v964_v41 = vsel %vm963_vm7, %v1130_v19, %v960_v7 }
 0x62f   :  { %v977_v13 = vmul.f32 %v964_v41, %v748_v6 }
 0x630   :  { %v968_v14 = vmul.f32 0.5, %v967_v39 }
 0x631   :  { %1014 = vperm.xlu2 %1115, %v751_v40   ;;  %991 = vperm.xlu0 %1114, %v977_v13  }
 0x632   :  { %v969_v46 = vsub.f32 1.5, %v968_v14 }
 0x633   :  { %v1010_v58 = vpop.permute.xlu0 %1009 }
 0x634   :  { %v970_v20 = vmul.f32 %v1132_v33, %v969_v46 }
 0x636   :  { %v974_v51 = vsel %vm973_vm10, %v1132_v33, %v970_v20 }
 0x637   :  { %v978_v28 = vmul.f32 %v974_v51, %v749_v49 }
 0x639   :  { %996 = vperm.xlu1 %1116, %v978_v28   ;;  %1024 = vperm.xlu0 %1114, %v753_v52  }
 0x641   :  { %1019 = vperm.xlu1 %1116, %v752_v27  }
 0x683   :  { %v987_v53 = vpop.permute.xlu2 %986 }
 0x684   :  { %v1001_v2 = vmul.f32 %v987_v53, %v1670_v44  ;;  %v1002_v12 = vmul.f32 %v987_v53, %v1672_v45 }
 0x68b   :  { %v1015_v0 = vpop.permute.xlu2 %1014 }
 0x68c   :  { %v1029_v4 = vadd.f32 %v1015_v0, %v1001_v2 }
 0x68e   :  { %v1037_v61 = vmax.f32 %v1029_v4, 0.0 }
 0x693   :  { %v982_v56 = vpop.permute.xlu1 %981 }
 0x694   :  { %v999_v57 = vmul.f32 %v982_v56, %v1662_v37  ;;  %v1000_v42 = vmul.f32 %v982_v56, %v1664_v38 }
 0x696   :  { %v1028_v59 = vadd.f32 %v1010_v58, %v1000_v42  ;;  %v1027_v60 = vadd.f32 %v1010_v58, %v999_v57 }
 0x698   :  { %v1036_v62 = vmax.f32 %v1028_v59, 0.0  ;;  %v1035_v35 = vmax.f32 %v1027_v60, 0.0 }
 0x69a   :  { %1062 = vadd.xlane.f32.xlu1 %v1036_v62  ;;  %1043 = vadd.xlane.f32.xlu2 %v1035_v35 }
 0x6a2   :  { %1045 = vadd.xlane.f32.xlu1 %v1037_v61 }
 0x6a3   :  { %v992_v63 = vpop.permute.xlu0 %991 }
 0x6a4   :  { %v1003_v9 = vmul.f32 %v992_v63, %v1678_v21  ;;  %v1004_v44 = vmul.f32 %v992_v63, %v1680_v50  ;;  %v1052_v21 = vmul.f32 128.0, %v1134_v17 }
 0x6a6   :  { %v1053_v18 = vsub.f32 1.0, %v1052_v21 }
 0x6a8   :  { %v1054_v50 = vmul.f32 %v1134_v17, %v1053_v18 }
 0x6aa   :  { %v1055_v19 = vadd.f32 %v1134_v17, %v1054_v50 }
 0x6ab   :  { %v997_v1 = vpop.permute.xlu1 %996  ;;  %v1025_v38 = vpop.permute.xlu0 %1024 }
 0x6ac   :  { %v1005_v3 = vmul.f32 %v997_v1, %v1686_v55  ;;  %v1006_v37 = vmul.f32 %v997_v1, %v1688_v47  ;;  %v1030_v47 = vadd.f32 %v1015_v0, %v1002_v12  ;;  %v1057_v22 = vsel %vm1056_vm11, %v1134_v17, %v1055_v19 }
 0x6ae   :  { %v1033_v5 = vadd.f32 %v1025_v38, %v1005_v3  ;;  %v1034_v54 = vadd.f32 %v1025_v38, %v1006_v37  ;;  %v1038_v15 = vmax.f32 %v1030_v47, 0.0 }
 0x6b0   :  { %v1041_v8 = vmax.f32 %v1033_v5, 0.0  ;;  %v1042_v48 = vmax.f32 %v1034_v54, 0.0 }
 0x6b2   :  { %1049 = vadd.xlane.f32.xlu2 %v1041_v8  ;;  %1068 = vadd.xlane.f32.xlu1 %v1042_v48 }
 0x6b3   :  { %v1020_v43 = vpop.permute.xlu1 %1019 }
 0x6b4   :  { %v1031_v36 = vadd.f32 %v1020_v43, %v1003_v9  ;;  %v1032_v10 = vadd.f32 %v1020_v43, %v1004_v44 }
 0x6b6   :  { %v1039_v11 = vmax.f32 %v1031_v36, 0.0  ;;  %v1040_v55 = vmax.f32 %v1032_v10, 0.0 }
 0x6b8   :  { %1047 = vadd.xlane.f32.xlu0 %v1039_v11 }
 0x6ba   :  { %1066 = vadd.xlane.f32.xlu2 %v1040_v55 }
 0x6c0   :  { %1064 = vadd.xlane.f32.xlu0 %v1038_v15 }
 0x70d   :  { %v1063_v23 = vpop.xlane.xlu1 %1062  ;;  %v1044_v24 = vpop.xlane.xlu2 %1043 }
 0x70e   :  { %v1070_v25 = vmul.f32 %v1063_v23, %v1057_v22  ;;  %v1058_v45 = vmul.f32 %v1057_v22, %v1044_v24 }
 0x710   :  { %v1075_v26 = vsel %vm1074_vm12, %v1058_v45, %v1070_v25 }
 0x711   :  { %1080 = vst.msk [vmem:[%s1755_s9] sm:$0xff] %vm1079_vm13, %v1075_v26 }
 0x715   :  { %v1046_v29 = vpop.xlane.xlu1 %1045 }
 0x716   :  { %v1059_v14 = vmul.f32 %v1057_v22, %v1046_v29 }
 0x725   :  { %v1069_v30 = vpop.xlane.xlu1 %1068  ;;  %v1050_v31 = vpop.xlane.xlu2 %1049 }
 0x726   :  { %v1073_v32 = vmul.f32 %v1069_v30, %v1057_v22  ;;  %v1061_v33 = vmul.f32 %v1057_v22, %v1050_v31 }
 0x728   :  { %v1078_v34 = vsel %vm1074_vm12, %v1061_v33, %v1073_v32 }
 0x729   :  { %1083 = vst.msk [vmem:[%s1755_s9 + $0x18] sm:$0xff] %vm1079_vm13, %v1078_v34 }
 0x72b   :  { %v1048_v6 = vpop.xlane.xlu0 %1047 }
 0x72c   :  { %v1060_v39 = vmul.f32 %v1057_v22, %v1048_v6 }
 0x72d   :  { %v1067_v7 = vpop.xlane.xlu2 %1066 }
 0x72e   :  { %v1072_v40 = vmul.f32 %v1067_v7, %v1057_v22 }
 0x730   :  { %v1077_v41 = vsel %vm1074_vm12, %v1060_v39, %v1072_v40 }
 0x731   :  { %1082 = vst.msk [vmem:[%s1755_s9 + $0x10] sm:$0xff] %vm1079_vm13, %v1077_v41 }
 0x733   :  { %v1065_v13 = vpop.xlane.xlu0 %1064 }
 0x734   :  { %v1071_v46 = vmul.f32 %v1065_v13, %v1057_v22 }
 0x736   :  { %v1076_v49 = vsel %vm1074_vm12, %v1059_v14, %v1071_v46 }
 0x737   :  { %1081 = vst.msk [vmem:[%s1755_s9 + $0x8] sm:$0xff] %vm1079_vm13, %v1076_v49 }
 0x738   :  { %1088 = vsyncpa [#allocation4], 1 }
 0x739   :  { %1089 = vsyncpa [#allocation6], 1 }

</bundles_post_ra>
